<compile_context>
chip_gen: v5e
topology: v5e:2x2
jax: 0.10.0
libtpu: 0.0.40
codegen_flags: <defaults>
</compile_context>

<pallas_src>
import functools

import jax
import jax.numpy as jnp
from jax.experimental import pallas as pl
from jax.experimental.pallas import tpu as pltpu


# ---------------------------------------------------------------------------
# Kernel: 1x1 conv (MXU matmul) + global max pool over a tiled spatial axis,
# bias/ReLU folded in at the end.  Grid = (batch, spatial_blocks).
# ---------------------------------------------------------------------------
def _conv_maxpool_kernel(x_ref, w1_ref, b1_ref, out_ref, acc_ref, *, hw):
    # x_ref  : (1, C, thw) f32   NCHW feature block (batch b, spatial tile k)
    # w1_ref : (M, C)      bf16  1x1-conv weight (torch [mid, in] layout)
    # b1_ref : (M, 1)      f32   1x1-conv bias (column)
    # out_ref: (1, M, 1)   f32   pooled ReLU(conv) features for batch b
    # acc_ref: (M, 1)      f32   running max over spatial tiles
    k = pl.program_id(1)
    thw = x_ref.shape[-1]

    @pl.when(k == 0)
    def _():
        acc_ref[...] = jnp.full(acc_ref.shape, -jnp.inf, dtype=acc_ref.dtype)

    # In-kernel bf16 cast (VPU, hidden under the HBM-bound DMA), then one MXU
    # matmul per (batch, spatial tile): (M, C) @ (C, thw) -> (M, thw), f32 acc.
    x_bf = x_ref[0].astype(jnp.bfloat16)
    y = jnp.dot(w1_ref[...], x_bf, preferred_element_type=jnp.float32)

    # Ragged spatial tail: mask out-of-range columns with -inf before the max
    # (a few VPU selects; replaces the former full-tensor jnp.pad HBM pass).
    if hw % thw != 0:
        col = jax.lax.broadcasted_iota(jnp.int32, (1, thw), 1)
        y = jnp.where(k * thw + col < hw, y, -jnp.inf)

    # Global max pool over this spatial tile (XLU lane reduce) + running max.
    acc_ref[...] = jnp.maximum(acc_ref[...], jnp.max(y, axis=1, keepdims=True))

    @pl.when(k == pl.num_programs(1) - 1)
    def _():
        # Bias + ReLU hoisted past the max pool (exact: per-column bias,
        # monotone ReLU).
        out_ref[0] = jnp.maximum(acc_ref[...] + b1_ref[...], 0.0)


def _choose_spatial_tile(hw, max_thw=2048):
    """Spatial tile size and number of spatial blocks."""
    if hw <= max_thw:
        return hw, 1                    # single exact block, no masking needed
    return max_thw, pl.cdiv(hw, max_thw)  # max_thw is a multiple of 128


@jax.jit
def ftex_v2_head(feat_nchw, w1, b1, w2, b2):
    """FtEx_v2 head on the backbone's out_inter[0].

    feat_nchw: [B, 1024, H, W] f32 (NCHW, consumed directly — no layout pass)
    w1: [M, 1024]  (Conv2d(1024, M, 1).weight[:, :, 0, 0])
    b1: [M]
    w2: [M, N]     (Linear(M, N).weight.T)
    b2: [N]
    Returns logits [B, N].
    """
    B, C, H, W = feat_nchw.shape
    M = w1.shape[0]
    HW = H * W
    thw, nk = _choose_spatial_tile(HW)

    # (B, C, H, W) -> (B, C, HW): contiguous view, no HBM traffic.
    x = feat_nchw.reshape(B, C, HW)
    w1_bf16 = w1.astype(jnp.bfloat16)               # (M, C), tiny one-off cast
    b1_col = b1.reshape(M, 1).astype(jnp.float32)   # (M, 1)

    cost = pl.CostEstimate(
        flops=2 * B * M * C * (nk * thw),
        transcendentals=0,
        bytes_accessed=(x.size * x.dtype.itemsize
                        + w1_bf16.size * 2 + M * 4 + B * M * 4),
    )

    pooled = pl.pallas_call(
        functools.partial(_conv_maxpool_kernel, hw=HW),
        out_shape=jax.ShapeDtypeStruct((B, M, 1), jnp.float32),
        grid=(B, nk),
        in_specs=[
            pl.BlockSpec((1, C, thw), lambda b, k: (b, 0, k)),
            pl.BlockSpec((M, C), lambda b, k: (0, 0)),
            pl.BlockSpec((M, 1), lambda b, k: (0, 0)),
        ],
        out_specs=pl.BlockSpec((1, M, 1), lambda b, k: (b, 0, 0)),
        scratch_shapes=[pltpu.VMEM((M, 1), jnp.float32)],
        compiler_params=pltpu.CompilerParams(
            dimension_semantics=("parallel", "arbitrary"),
            vmem_limit_bytes=48 * 1024 * 1024,   # fits v7x 64 MiB physical VMEM
        ),
        cost_estimate=cost,
    )(x, w1_bf16, b1_col)

    z = pooled.reshape(B, M)                 # pooled ReLU(conv) features
    # Dropout(0.15) -> identity in eval mode.
    # fc as one small XLA matmul (avoids 10-wide masked stores in-kernel).
    logits = z @ w2 + b2                     # (B, N) f32
    return logits


def ftex_v2_forward(feat_nchw, params):
    """Mirrors FtEx_v2.forward on the head: returns (logits, out_inter)."""
    logits = ftex_v2_head(
        feat_nchw, params["w1"], params["b1"], params["w2"], params["b2"]
    )
    return logits, [feat_nchw]


# ---------------------------------------------------------------------------
# Pure-JAX references for correctness checks.
# ---------------------------------------------------------------------------
def _reference_f32(feat_nchw, params):
    """Exact f32 reference following the original PyTorch op order."""
    B, C, H, W = feat_nchw.shape
    x = jnp.transpose(feat_nchw, (0, 2, 3, 1)).reshape(B, H * W, C)
    y = jnp.maximum(
        jnp.einsum("bpc,mc->bpm", x, params["w1"]) + params["b1"], 0.0
    )
    z = jnp.max(y, axis=1)                               # global max pool
    return z @ params["w2"] + params["b2"]


def _reference_bf16(feat_nchw, params):
    """Reference with the same bf16-input / f32-accum matmul as the kernel."""
    B, C, H, W = feat_nchw.shape
    x = jnp.transpose(feat_nchw, (0, 2, 3, 1)).reshape(B, H * W, C)
    y = jnp.einsum(
        "bpc,mc->bpm",
        x.astype(jnp.bfloat16),
        params["w1"].astype(jnp.bfloat16),
        preferred_element_type=jnp.float32,
    )
    z = jnp.maximum(jnp.max(y, axis=1) + params["b1"], 0.0)  # hoisted (exact)
    return z @ params["w2"] + params["b2"]


if __name__ == "__main__":
    # Architecture-consistent small shapes: the backbone's intermediate
    # feature map has 1024 channels; B=2, H=W=8 spatial.
    B, C, H, W = 2, 1024, 8, 8
    mid_size = 256
    n_classes = 10

    key = jax.random.PRNGKey(0)
    k_feat, k_w1, k_b1, k_w2, k_b2 = jax.random.split(key, 5)

    feat = jax.random.normal(k_feat, (B, C, H, W), dtype=jnp.float32)

    params = {
        # Conv2d(1024, mid, 1): torch weight [mid, 1024, 1, 1] -> [mid, 1024]
        "w1": jax.random.normal(k_w1, (mid_size, C), dtype=jnp.float32) * 0.02,
        "b1": jax.random.normal(k_b1, (mid_size,), dtype=jnp.float32) * 0.02,
        # Linear(mid, n_classes): torch weight [n, mid] -> [mid, n]
        "w2": jax.random.normal(k_w2, (mid_size, n_classes), dtype=jnp.float32) * 0.02,
        "b2": jax.random.normal(k_b2, (n_classes,), dtype=jnp.float32) * 0.02,
    }

    logits, out_inter = ftex_v2_forward(feat, params)
    logits = jax.block_until_ready(logits)
    assert logits.shape == (B, n_classes)

    # Tight check vs a bf16-matmul-matched reference.
    ref_bf16 = jax.block_until_ready(_reference_bf16(feat, params))
    assert jnp.allclose(logits, ref_bf16, atol=5e-3, rtol=5e-3), \
        "mismatch vs bf16-matched reference"

    # Looser check vs the exact f32 reference (bf16 matmul inputs).
    ref_f32 = jax.block_until_ready(_reference_f32(feat, params))
    assert jnp.allclose(logits, ref_f32, atol=3e-2, rtol=3e-2), \
        "mismatch vs f32 reference"

    print("KERNEL_OK")
</pallas_src>

<mosaic_0001>
module attributes {stable_mosaic.version = 11 : i64} {
  func.func @_conv_maxpool_kernel(%arg0: i32, %arg1: i32, %arg2: memref<1x1024x64xf32, #tpu.memory_space<vmem>>, %arg3: memref<256x1024xbf16, #tpu.memory_space<vmem>>, %arg4: memref<256x1xf32, #tpu.memory_space<vmem>>, %arg5: memref<1x256x1xf32, #tpu.memory_space<vmem>>, %arg6: memref<256x1xf32, #tpu.memory_space<vmem>>) attributes {dimension_semantics = [#tpu.dimension_semantics<parallel>, #tpu.dimension_semantics<arbitrary>], iteration_bounds = array<i64: 2, 1>, scalar_prefetch = 0 : i64, scratch_operands = 1 : i64, tpu.core_type = #tpu.core_type<tc>, window_params = [{transform_indices = @transform_0, window_bounds = array<i64: 1, 1024, 64>}, {pipeline_mode = #tpu.pipeline_mode<synchronous>, transform_indices = @transform_1, window_bounds = array<i64: 256, 1024>}, {pipeline_mode = #tpu.pipeline_mode<synchronous>, transform_indices = @transform_2, window_bounds = array<i64: 256, 1>}, {transform_indices = @transform_3, window_bounds = array<i64: 1, 256, 1>}]} {
    %c0_i32 = arith.constant 0 : i32
    %0 = arith.cmpi eq, %arg1, %c0_i32 : i32
    %1 = arith.extui %0 : i1 to i32
    %c0_i32_0 = arith.constant 0 : i32
    %2 = arith.cmpi ne, %1, %c0_i32_0 : i32
    scf.if %2 {
      %cst_12 = arith.constant 0xFF800000 : f32
      %16 = vector.broadcast %cst_12 : f32 to vector<256x1xf32>
      %c0_13 = arith.constant 0 : index
      %c0_14 = arith.constant 0 : index
      %17 = vector.load %arg6[%c0_13, %c0_14] : memref<256x1xf32, #tpu.memory_space<vmem>>, vector<256x1xf32>
      tpu.vector_store %arg6[%c0_13, %c0_14], %16 {strides = array<i32>} : memref<256x1xf32, #tpu.memory_space<vmem>>, vector<256x1xf32>,
    } else {
    }
    %c0 = arith.constant 0 : index
    %c0_1 = arith.constant 0 : index
    %c0_2 = arith.constant 0 : index
    %3 = vector.load %arg2[%c0, %c0_1, %c0_2] : memref<1x1024x64xf32, #tpu.memory_space<vmem>>, vector<1x1024x64xf32>
    %4 = vector.shape_cast %3 : vector<1x1024x64xf32> to vector<1024x64xf32>
    %5 = arith.truncf %4 : vector<1024x64xf32> to vector<1024x64xbf16>
    %c0_3 = arith.constant 0 : index
    %c0_4 = arith.constant 0 : index
    %6 = vector.load %arg3[%c0_3, %c0_4] : memref<256x1024xbf16, #tpu.memory_space<vmem>>, vector<256x1024xbf16>
    %cst = arith.constant dense<0.000000e+00> : vector<256x64xf32>
    %7 = tpu.matmul %6, %5, %cst {dimension_numbers = #tpu.dot_dimension_numbers<[1], [0], [0], [1], [0, 0, 1, 1], [], []>} : vector<256x1024xbf16>, vector<1024x64xbf16>, vector<256x64xf32> -> vector<256x64xf32>
    %c0_5 = arith.constant 0 : index
    %c0_6 = arith.constant 0 : index
    %8 = vector.load %arg6[%c0_5, %c0_6] : memref<256x1xf32, #tpu.memory_space<vmem>>, vector<256x1xf32>
    %cst_7 = arith.constant dense<0xFF800000> : vector<256xf32>
    %9 = vector.multi_reduction <maximumf>, %7, %cst_7 [1] : vector<256x64xf32> to vector<256xf32>
    %10 = vector.shape_cast %9 : vector<256xf32> to vector<256x1xf32>
    %11 = arith.maximumf %8, %10 : vector<256x1xf32>
    %c0_8 = arith.constant 0 : index
    %c0_9 = arith.constant 0 : index
    %12 = vector.load %arg6[%c0_8, %c0_9] : memref<256x1xf32, #tpu.memory_space<vmem>>, vector<256x1xf32>
    tpu.vector_store %arg6[%c0_8, %c0_9], %11 {strides = array<i32>} : memref<256x1xf32, #tpu.memory_space<vmem>>, vector<256x1xf32>,
    %c0_i32_10 = arith.constant 0 : i32
    %13 = arith.cmpi eq, %arg1, %c0_i32_10 : i32
    %14 = arith.extui %13 : i1 to i32
    %c0_i32_11 = arith.constant 0 : i32
    %15 = arith.cmpi ne, %14, %c0_i32_11 : i32
    scf.if %15 {
      %c0_12 = arith.constant 0 : index
      %c0_13 = arith.constant 0 : index
      %16 = vector.load %arg6[%c0_12, %c0_13] : memref<256x1xf32, #tpu.memory_space<vmem>>, vector<256x1xf32>
      %c0_14 = arith.constant 0 : index
      %c0_15 = arith.constant 0 : index
      %17 = vector.load %arg4[%c0_14, %c0_15] : memref<256x1xf32, #tpu.memory_space<vmem>>, vector<256x1xf32>
      %18 = arith.addf %16, %17 : vector<256x1xf32>
      %cst_16 = arith.constant 0.000000e+00 : f32
      %19 = vector.broadcast %cst_16 : f32 to vector<256x1xf32>
      %20 = arith.maximumf %18, %19 : vector<256x1xf32>
      %c0_17 = arith.constant 0 : index
      %c0_18 = arith.constant 0 : index
      %c0_19 = arith.constant 0 : index
      %21 = vector.load %arg5[%c0_17, %c0_18, %c0_19] : memref<1x256x1xf32, #tpu.memory_space<vmem>>, vector<1x256x1xf32>
      %22 = vector.shape_cast %21 : vector<1x256x1xf32> to vector<256x1xf32>
      %23 = vector.shape_cast %20 : vector<256x1xf32> to vector<1x256x1xf32>
      tpu.vector_store %arg5[%c0_17, %c0_18, %c0_19], %23 {strides = array<i32>} : memref<1x256x1xf32, #tpu.memory_space<vmem>>, vector<1x256x1xf32>,
    } else {
    }
    return
  }
  func.func @transform_0(%arg0: i32, %arg1: i32) -> (i32, i32, i32) {
    %c0_i32 = arith.constant 0 : i32
    %c0_i32_0 = arith.constant 0 : i32
    return %arg0, %c0_i32, %arg1 : i32, i32, i32
  }
  func.func @transform_1(%arg0: i32, %arg1: i32) -> (i32, i32) {
    %c0_i32 = arith.constant 0 : i32
    %c0_i32_0 = arith.constant 0 : i32
    %c0_i32_1 = arith.constant 0 : i32
    return %c0_i32, %c0_i32_0 : i32, i32
  }
  func.func @transform_2(%arg0: i32, %arg1: i32) -> (i32, i32) {
    %c0_i32 = arith.constant 0 : i32
    %c0_i32_0 = arith.constant 0 : i32
    %c0_i32_1 = arith.constant 0 : i32
    return %c0_i32, %c0_i32_0 : i32, i32
  }
  func.func @transform_3(%arg0: i32, %arg1: i32) -> (i32, i32, i32) {
    %c0_i32 = arith.constant 0 : i32
    %c0_i32_0 = arith.constant 0 : i32
    %c0_i32_1 = arith.constant 0 : i32
    return %arg0, %c0_i32, %c0_i32_0 : i32, i32, i32
  }
}

</mosaic_0001>

<bundles_post_ra>
// kernel: ftex_v2_head.1
= control target key start
LH: loop header
LB: loop body
LE: loop exit
PB: predicated region body
PF: predicated region fallthrough
CT: control target
= control target key end

     0   :  { %s3052_s12 = smov 0   ;;  %s3054_s13 = smov 0   ;;  %s4373_s0 = inlined_call_operand.vmem [shape: f32[2,1024,64], index: 0, kind: input, shape index: {}]   ;;  %s4374_s1 = inlined_call_operand.vmem [shape: bf16[256,1024], index: 1, kind: input, shape index: {}]   ;;  %s4375_s2 = inlined_call_operand.vmem [shape: f32[256,1], index: 2, kind: input, shape index: {}]   ;;  %s4376_s3 = inlined_call_operand.vmem [shape: f32[2,256,1], index: 3, kind: output, shape index: {}]  }
   0x1   :  { %s3056_s14 = smov 0  }
   0x2 LB: > { %s25_s15 = sadd.s32 1, %s3025_s13  ;;  %p2333_p0 = scmp.ge.s32.totalorder %s3029_s14, 1  ;;  %s3029_s14 = sphi %s3056_s14, %s13_s14   ;;  %s3025_s13 = sphi %s3054_s13, %s4378_s13   ;;  %s3021_s12 = sphi %s3052_s12, %s4377_s12  }
   0x3   : > { %p27_p1 = scmp.ge.s32.totalorder %s25_s15, 2  ;;  %p154_p2 = scmp.lt.s32.totalorder %s3029_s14, 3 }
   0x5   : > { %s4380_s15 = smov (%p27_p1, %s25_s15), 0  ;;  %p155_p3 = pnand %p2333_p0, %p154_p2 }
   0x6   : > { %p181_p4 = scmp.lt.s32.totalorder (!%p155_p3), %s3021_s12, 1 }
   0x7   : > { %158 = sbr.rel (%p155_p3) target bundleno = 823 (0x337), region = 32 }
   0xc   : > { %s4382_s12 = smov (!%p181_p4, %s3021_s12), 1  ;;  %vm1935_vm0 = vcmask 523264   ;;  %vm198_vm1 = vcmask 7168  }
   0xd   : > { %s2852_s16 = sshll.u32 %s4382_s12, 10  ;;  %s2853_s10 = sshll.u32 %s4382_s12, 8 }
   0xe   : > { %s3076_s19 = scalar_lea.vmem %s4373_s0, %s2852_s16 }
   0xf   : > { %v245_v0 = vld [vmem:[%s3076_s19 + $0x70] sm:$0xff]  ;;  %v246_v1 = vld [vmem:[%s3076_s19 + $0x78] sm:$0xff]  ;;  %v243_v11 = vld [vmem:[%s3076_s19 + $0x60] sm:$0xff] }
  0x10   : > { %v261_v2 = vld [vmem:[%s3076_s19 + $0xf0] sm:$0xff]  ;;  %v366_v3 = vpack.c.bf16 %v246_v1, %v245_v0  ;;  %v262_v4 = vld [vmem:[%s3076_s19 + $0xf8] sm:$0xff]  ;;  %v244_v13 = vld [vmem:[%s3076_s19 + $0x68] sm:$0xff] }
  0x11   : > { %v277_v5 = vld [vmem:[%s3076_s19 + $0x170] sm:$0xff]  ;;  %v278_v6 = vld [vmem:[%s3076_s19 + $0x178] sm:$0xff]  ;;  %v374_v7 = vpack.c.bf16 %v262_v4, %v261_v2  ;;  %v259_v14 = vld [vmem:[%s3076_s19 + $0xe0] sm:$0xff]  ;;  %v365_v16 = vpack.c.bf16 %v244_v13, %v243_v11 }
  0x12   : > { %v382_v8 = vpack.c.bf16 %v278_v6, %v277_v5  ;;  %v293_v9 = vld [vmem:[%s3076_s19 + $0x1f0] sm:$0xff]  ;;  %v294_v10 = vld [vmem:[%s3076_s19 + $0x1f8] sm:$0xff]  ;;  %1191 = vmatpush.bf16.msra.mxu0 %v366_v3  ;;  %v260_v15 = vld [vmem:[%s3076_s19 + $0xe8] sm:$0xff] }
  0x13   : > { %v390_v12 = vpack.c.bf16 %v294_v10, %v293_v9  ;;  %1280 = vmatpush.bf16.msra.mxu1 %v374_v7  ;;  %v373_v17 = vpack.c.bf16 %v260_v15, %v259_v14  ;;  %v275_v18 = vld [vmem:[%s3076_s19 + $0x160] sm:$0xff]  ;;  %v276_v19 = vld [vmem:[%s3076_s19 + $0x168] sm:$0xff]  ;;  %v241_v23 = vld [vmem:[%s3076_s19 + $0x50] sm:$0xff] }
  0x14   : > { %1369 = vmatpush.bf16.msra.mxu2 %v382_v8  ;;  %v291_v20 = vld [vmem:[%s3076_s19 + $0x1e0] sm:$0xff]  ;;  %v381_v21 = vpack.c.bf16 %v276_v19, %v275_v18  ;;  %v292_v22 = vld [vmem:[%s3076_s19 + $0x1e8] sm:$0xff]  ;;  %v242_v24 = vld [vmem:[%s3076_s19 + $0x58] sm:$0xff] }
  0x15   : > { %1458 = vmatpush.bf16.msra.mxu3 %v390_v12  ;;  %v389_v25 = vpack.c.bf16 %v292_v22, %v291_v20  ;;  %v257_v26 = vld [vmem:[%s3076_s19 + $0xd0] sm:$0xff]  ;;  %v258_v27 = vld [vmem:[%s3076_s19 + $0xd8] sm:$0xff]  ;;  %v364_v29 = vpack.c.bf16 %v242_v24, %v241_v23  ;;  %v239_v35 = vld [vmem:[%s3076_s19 + $0x40] sm:$0xff] }
  0x16   : > { %v273_v28 = vld [vmem:[%s3076_s19 + $0x150] sm:$0xff]  ;;  %1192 = vmatpush.bf16.msra.mxu0 %v365_v16  ;;  %v274_v30 = vld [vmem:[%s3076_s19 + $0x158] sm:$0xff]  ;;  %v372_v33 = vpack.c.bf16 %v258_v27, %v257_v26  ;;  %v240_v36 = vld [vmem:[%s3076_s19 + $0x48] sm:$0xff] }
  0x17   : > { %v289_v31 = vld [vmem:[%s3076_s19 + $0x1d0] sm:$0xff]  ;;  %v290_v32 = vld [vmem:[%s3076_s19 + $0x1d8] sm:$0xff]  ;;  %1281 = vmatpush.bf16.msra.mxu1 %v373_v17  ;;  %v380_v34 = vpack.c.bf16 %v274_v30, %v273_v28  ;;  %v255_v37 = vld [vmem:[%s3076_s19 + $0xc0] sm:$0xff]  ;;  %v363_v44 = vpack.c.bf16 %v240_v36, %v239_v35 }
  0x18   : > { %1370 = vmatpush.bf16.msra.mxu2 %v381_v21  ;;  %v388_v38 = vpack.c.bf16 %v290_v32, %v289_v31  ;;  %v256_v39 = vld [vmem:[%s3076_s19 + $0xc8] sm:$0xff]  ;;  %v271_v40 = vld [vmem:[%s3076_s19 + $0x140] sm:$0xff]  ;;  %v237_v47 = vld [vmem:[%s3076_s19 + $0x30] sm:$0xff] }
  0x19   : > { %1459 = vmatpush.bf16.msra.mxu3 %v389_v25  ;;  %v272_v41 = vld [vmem:[%s3076_s19 + $0x148] sm:$0xff]  ;;  %v287_v42 = vld [vmem:[%s3076_s19 + $0x1c0] sm:$0xff]  ;;  %v371_v45 = vpack.c.bf16 %v256_v39, %v255_v37  ;;  %v238_v48 = vld [vmem:[%s3076_s19 + $0x38] sm:$0xff] }
  0x1a   : > { %v288_v43 = vld [vmem:[%s3076_s19 + $0x1c8] sm:$0xff]  ;;  %1193 = vmatpush.bf16.msra.mxu0 %v364_v29  ;;  %v379_v46 = vpack.c.bf16 %v272_v41, %v271_v40  ;;  %v253_v49 = vld [vmem:[%s3076_s19 + $0xb0] sm:$0xff]  ;;  %v254_v51 = vld [vmem:[%s3076_s19 + $0xb8] sm:$0xff]  ;;  %v362_v56 = vpack.c.bf16 %v238_v48, %v237_v47 }
  0x1b   : > { %1282 = vmatpush.bf16.msra.mxu1 %v372_v33  ;;  %v387_v50 = vpack.c.bf16 %v288_v43, %v287_v42  ;;  %v269_v52 = vld [vmem:[%s3076_s19 + $0x130] sm:$0xff]  ;;  %v270_v53 = vld [vmem:[%s3076_s19 + $0x138] sm:$0xff]  ;;  %v370_v57 = vpack.c.bf16 %v254_v51, %v253_v49  ;;  %v235_v59 = vld [vmem:[%s3076_s19 + $0x20] sm:$0xff] }
  0x1c   : > { %1371 = vmatpush.bf16.msra.mxu2 %v380_v34  ;;  %v285_v54 = vld [vmem:[%s3076_s19 + $0x1b0] sm:$0xff]  ;;  %v286_v55 = vld [vmem:[%s3076_s19 + $0x1b8] sm:$0xff]  ;;  %v378_v58 = vpack.c.bf16 %v270_v53, %v269_v52  ;;  %v236_v60 = vld [vmem:[%s3076_s19 + $0x28] sm:$0xff] }
  0x1d   : > { %1460 = vmatpush.bf16.msra.mxu3 %v388_v38  ;;  %v251_v61 = vld [vmem:[%s3076_s19 + $0xa0] sm:$0xff]  ;;  %v386_v62 = vpack.c.bf16 %v286_v55, %v285_v54  ;;  %v252_v63 = vld [vmem:[%s3076_s19 + $0xa8] sm:$0xff]  ;;  %v361_v4 = vpack.c.bf16 %v236_v60, %v235_v59  ;;  %v233_v7 = vld [vmem:[%s3076_s19 + $0x10] sm:$0xff] }
  0x1e   : > { %1194 = vmatpush.bf16.msra.mxu0 %v363_v44  ;;  %v267_v0 = vld [vmem:[%s3076_s19 + $0x120] sm:$0xff]  ;;  %v268_v1 = vld [vmem:[%s3076_s19 + $0x128] sm:$0xff]  ;;  %v369_v5 = vpack.c.bf16 %v252_v63, %v251_v61  ;;  %v234_v8 = vld [vmem:[%s3076_s19 + $0x18] sm:$0xff] }
  0x1f   : > { %1283 = vmatpush.bf16.msra.mxu1 %v371_v45  ;;  %v283_v2 = vld [vmem:[%s3076_s19 + $0x1a0] sm:$0xff]  ;;  %v284_v3 = vld [vmem:[%s3076_s19 + $0x1a8] sm:$0xff]  ;;  %v377_v6 = vpack.c.bf16 %v268_v1, %v267_v0  ;;  %v249_v9 = vld [vmem:[%s3076_s19 + $0x90] sm:$0xff]  ;;  %v360_v17 = vpack.c.bf16 %v234_v8, %v233_v7 }
  0x20   : > { %1372 = vmatpush.bf16.msra.mxu2 %v379_v46  ;;  %v385_v10 = vpack.c.bf16 %v284_v3, %v283_v2  ;;  %v250_v11 = vld [vmem:[%s3076_s19 + $0x98] sm:$0xff]  ;;  %v265_v12 = vld [vmem:[%s3076_s19 + $0x110] sm:$0xff]  ;;  %v231_v16 = vld [vmem:[%s3076_s19] sm:$0xff] }
  0x21   : > { %1461 = vmatpush.bf16.msra.mxu3 %v387_v50  ;;  %v266_v13 = vld [vmem:[%s3076_s19 + $0x118] sm:$0xff]  ;;  %v281_v14 = vld [vmem:[%s3076_s19 + $0x190] sm:$0xff]  ;;  %v232_v18 = vld [vmem:[%s3076_s19 + $0x8] sm:$0xff]  ;;  %v368_v21 = vpack.c.bf16 %v250_v11, %v249_v9 }
  0x22   : > { %1195 = vmatpush.bf16.msra.mxu0 %v362_v56  ;;  %v282_v15 = vld [vmem:[%s3076_s19 + $0x198] sm:$0xff]  ;;  %v247_v19 = vld [vmem:[%s3076_s19 + $0x80] sm:$0xff]  ;;  %v248_v20 = vld [vmem:[%s3076_s19 + $0x88] sm:$0xff]  ;;  %v376_v22 = vpack.c.bf16 %v266_v13, %v265_v12  ;;  %v359_v33 = vpack.c.bf16 %v232_v18, %v231_v16 }
  0x23   : > { %1284 = vmatpush.bf16.msra.mxu1 %v370_v57  ;;  %v263_v23 = vld [vmem:[%s3076_s19 + $0x100] sm:$0xff]  ;;  %v264_v24 = vld [vmem:[%s3076_s19 + $0x108] sm:$0xff]  ;;  %v384_v26 = vpack.c.bf16 %v282_v15, %v281_v14  ;;  %v341_v31 = vld [vmem:[%s3076_s19 + $0x370] sm:$0xff]  ;;  %v367_v37 = vpack.c.bf16 %v248_v20, %v247_v19 }
  0x24   : > { %1373 = vmatpush.bf16.msra.mxu2 %v378_v58  ;;  %v279_v25 = vld [vmem:[%s3076_s19 + $0x180] sm:$0xff]  ;;  %v280_v27 = vld [vmem:[%s3076_s19 + $0x188] sm:$0xff]  ;;  %v342_v32 = vld [vmem:[%s3076_s19 + $0x378] sm:$0xff]  ;;  %v375_v38 = vpack.c.bf16 %v264_v24, %v263_v23 }
  0x25   : > { %1462 = vmatpush.bf16.msra.mxu3 %v386_v62  ;;  %v2340_v28 = vld [vmem:[%s4374_s1] sm:$0xf]  ;;  %v2854_v30 = vld [vmem:[%s4374_s1 + $0x4] sm:$0xf]  ;;  %v357_v35 = vld [vmem:[%s3076_s19 + $0x3f0] sm:$0xff]  ;;  %v383_v42 = vpack.c.bf16 %v280_v27, %v279_v25  ;;  %v414_v44 = vpack.c.bf16 %v342_v32, %v341_v31 }
  0x26   : > { %1196 = vmatpush.bf16.msra.mxu0 %v361_v4  ;;  %v2858_v29 = vld [vmem:[%s4374_s1 + $0x1c] sm:$0xf0]  ;;  %v2342_v34 = vld [vmem:[%s4374_s1 + $0x20] sm:$0xf0]  ;;  %v358_v36 = vld [vmem:[%s3076_s19 + $0x3f8] sm:$0xff] }
  0x27   : > { %1285 = vmatpush.bf16.msra.mxu1 %v369_v5  ;;  %v2348_v39 = vld [vmem:[%s4374_s1 + $0x8] sm:$0xf]  ;;  %v2855_v41 = vld [vmem:[%s4374_s1 + $0xc] sm:$0xf]  ;;  %v309_v45 = vld [vmem:[%s3076_s19 + $0x270] sm:$0xff]  ;;  %v2341_v47 = vor.u32 %v2858_v29, %v2340_v28  ;;  %v422_v48 = vpack.c.bf16 %v358_v36, %v357_v35  ;;  %v2345_v51 = vor.u32 %v2854_v30, %v2342_v34 }
  0x28   : > { %1374 = vmatpush.bf16.msra.mxu2 %v377_v6  ;;  %v2859_v40 = vld [vmem:[%s4374_s1 + $0x24] sm:$0xf0]  ;;  %v2350_v43 = vld [vmem:[%s4374_s1 + $0x28] sm:$0xf0]  ;;  %v310_v46 = vld [vmem:[%s3076_s19 + $0x278] sm:$0xff] }
  0x29   : > { %1463 = vmatpush.bf16.msra.mxu3 %v385_v10  ;;  %v325_v49 = vld [vmem:[%s3076_s19 + $0x2f0] sm:$0xff]  ;;  %v326_v50 = vld [vmem:[%s3076_s19 + $0x2f8] sm:$0xff]  ;;  %v2349_v52 = vor.u32 %v2859_v40, %v2348_v39  ;;  %v2353_v53 = vor.u32 %v2855_v41, %v2350_v43  ;;  %v398_v54 = vpack.c.bf16 %v310_v46, %v309_v45  ;;  %v339_v56 = vld [vmem:[%s3076_s19 + $0x360] sm:$0xff] }
  0x2a   : > { %1197 = vmatpush.bf16.msra.mxu0 %v360_v17  ;;  %v406_v55 = vpack.c.bf16 %v326_v50, %v325_v49  ;;  %v340_v57 = vld [vmem:[%s3076_s19 + $0x368] sm:$0xff]  ;;  %v307_v58 = vld [vmem:[%s3076_s19 + $0x260] sm:$0xff]  ;;  %v337_v28 = vld [vmem:[%s3076_s19 + $0x350] sm:$0xff] }
  0x2b   : > { %1286 = vmatpush.bf16.msra.mxu1 %v368_v21  ;;  %v413_v59 = vpack.c.bf16 %v340_v57, %v339_v56  ;;  %v308_v60 = vld [vmem:[%s3076_s19 + $0x268] sm:$0xff]  ;;  %v355_v61 = vld [vmem:[%s3076_s19 + $0x3e0] sm:$0xff]  ;;  %v338_v29 = vld [vmem:[%s3076_s19 + $0x358] sm:$0xff] }
  0x2c   : > { %1375 = vmatpush.bf16.msra.mxu2 %v376_v22  ;;  %v356_v62 = vld [vmem:[%s3076_s19 + $0x3e8] sm:$0xff]  ;;  %v397_v63 = vpack.c.bf16 %v308_v60, %v307_v58  ;;  %v323_v1 = vld [vmem:[%s3076_s19 + $0x2e0] sm:$0xff]  ;;  %v305_v30 = vld [vmem:[%s3076_s19 + $0x250] sm:$0xff]  ;;  %v412_v31 = vpack.c.bf16 %v338_v29, %v337_v28 }
  0x2d   : > { %1464 = vmatpush.bf16.msra.mxu3 %v384_v26  ;;  %v421_v0 = vpack.c.bf16 %v356_v62, %v355_v61  ;;  %v324_v2 = vld [vmem:[%s3076_s19 + $0x2e8] sm:$0xff]  ;;  %v2372_v4 = vld [vmem:[%s4374_s1 + $0x40] sm:$0xf]  ;;  %v2862_v6 = vld [vmem:[%s4374_s1 + $0x44] sm:$0xf] }
  0x2e   : > { %1198 = vmatpush.bf16.msra.mxu0 %v359_v33  ;;  %v405_v3 = vpack.c.bf16 %v324_v2, %v323_v1  ;;  %v2866_v5 = vld [vmem:[%s4374_s1 + $0x5c] sm:$0xf0]  ;;  %v2374_v7 = vld [vmem:[%s4374_s1 + $0x60] sm:$0xf0]  ;;  %v2380_v8 = vld [vmem:[%s4374_s1 + $0x48] sm:$0xf] }
  0x2f   : > { %1287 = vmatpush.bf16.msra.mxu1 %v367_v37  ;;  %v2867_v9 = vld [vmem:[%s4374_s1 + $0x64] sm:$0xf0]  ;;  %v2863_v10 = vld [vmem:[%s4374_s1 + $0x4c] sm:$0xf]  ;;  %v2373_v12 = vor.u32 %v2866_v5, %v2372_v4  ;;  %v2377_v13 = vor.u32 %v2862_v6, %v2374_v7  ;;  %v2404_v16 = vld [vmem:[%s4374_s1 + $0x80] sm:$0xf] }
  0x30   : > { %1376 = vmatpush.bf16.msra.mxu2 %v375_v38  ;;  %v2382_v11 = vld [vmem:[%s4374_s1 + $0x68] sm:$0xf0]  ;;  %v2381_v14 = vor.u32 %v2867_v9, %v2380_v8  ;;  %v2874_v17 = vld [vmem:[%s4374_s1 + $0x9c] sm:$0xf0]  ;;  %v2870_v18 = vld [vmem:[%s4374_s1 + $0x84] sm:$0xf] }
  0x31   : > { %1465 = vmatpush.bf16.msra.mxu3 %v383_v42  ;;  %1199 = vmatmul.bf16.vlgmr.msra.gmra.mxu0 %v2341_v47  ;;  %v2385_v15 = vor.u32 %v2863_v10, %v2382_v11  ;;  %v2406_v19 = vld [vmem:[%s4374_s1 + $0xa0] sm:$0xf0]  ;;  %v2412_v20 = vld [vmem:[%s4374_s1 + $0x88] sm:$0xf]  ;;  %v2871_v22 = vld [vmem:[%s4374_s1 + $0x8c] sm:$0xf]  ;;  %v2405_v24 = vor.u32 %v2874_v17, %v2404_v16 }
  0x32   : > { %1288 = vmatmul.bf16.vlgmr.msra.gmra.mxu1 %v2345_v51  ;;  %1547 = vmatpush.bf16.msrb.mxu0 %v398_v54  ;;  %v2875_v21 = vld [vmem:[%s4374_s1 + $0xa4] sm:$0xf0]  ;;  %v2414_v23 = vld [vmem:[%s4374_s1 + $0xa8] sm:$0xf0]  ;;  %v2409_v25 = vor.u32 %v2870_v18, %v2406_v19  ;;  %v306_v32 = vld [vmem:[%s3076_s19 + $0x258] sm:$0xff] }
  0x33   : > { %1377 = vmatmul.bf16.vlgmr.msra.gmra.mxu2 %v2349_v52  ;;  %1636 = vmatpush.bf16.msrb.mxu1 %v406_v55  ;;  %v2413_v26 = vor.u32 %v2875_v21, %v2412_v20  ;;  %v2417_v27 = vor.u32 %v2871_v22, %v2414_v23  ;;  %v353_v33 = vld [vmem:[%s3076_s19 + $0x3d0] sm:$0xff]  ;;  %v354_v34 = vld [vmem:[%s3076_s19 + $0x3d8] sm:$0xff]  ;;  %v396_v35 = vpack.c.bf16 %v306_v32, %v305_v30  ;;  %v2436_v40 = vld [vmem:[%s4374_s1 + $0xc0] sm:$0xf] }
  0x34   : > { %1725 = vmatpush.bf16.msrb.mxu2 %v414_v44  ;;  %1466 = vmatmul.bf16.vlgmr.msra.gmra.mxu3 %v2353_v53  ;;  %v420_v36 = vpack.c.bf16 %v354_v34, %v353_v33  ;;  %v321_v37 = vld [vmem:[%s3076_s19 + $0x2d0] sm:$0xff]  ;;  %v322_v38 = vld [vmem:[%s3076_s19 + $0x2d8] sm:$0xff]  ;;  %v2882_v41 = vld [vmem:[%s4374_s1 + $0xdc] sm:$0xf0] }
  0x35   : > { %1814 = vmatpush.bf16.msrb.mxu3 %v422_v48  ;;  %v404_v39 = vpack.c.bf16 %v322_v38, %v321_v37  ;;  %v2878_v42 = vld [vmem:[%s4374_s1 + $0xc4] sm:$0xf]  ;;  %v2444_v44 = vld [vmem:[%s4374_s1 + $0xc8] sm:$0xf]  ;;  %v2879_v46 = vld [vmem:[%s4374_s1 + $0xcc] sm:$0xf]  ;;  %v2437_v48 = vor.u32 %v2882_v41, %v2436_v40 }
  0x36   : > { %1548 = vmatpush.bf16.msrb.mxu0 %v397_v63  ;;  %v2438_v43 = vld [vmem:[%s4374_s1 + $0xe0] sm:$0xf0]  ;;  %v2883_v45 = vld [vmem:[%s4374_s1 + $0xe4] sm:$0xf0]  ;;  %v2446_v47 = vld [vmem:[%s4374_s1 + $0xe8] sm:$0xf0] }
  0x37   : > { %1637 = vmatpush.bf16.msrb.mxu1 %v405_v3  ;;  %v2441_v49 = vor.u32 %v2878_v42, %v2438_v43  ;;  %v2445_v50 = vor.u32 %v2883_v45, %v2444_v44  ;;  %v2449_v51 = vor.u32 %v2879_v46, %v2446_v47  ;;  %v2468_v52 = vld [vmem:[%s4374_s1 + $0x100] sm:$0xf]  ;;  %v2886_v54 = vld [vmem:[%s4374_s1 + $0x104] sm:$0xf]  ;;  %v2476_v56 = vld [vmem:[%s4374_s1 + $0x108] sm:$0xf] }
  0x38   : > { %1726 = vmatpush.bf16.msrb.mxu2 %v413_v59  ;;  %v2890_v53 = vld [vmem:[%s4374_s1 + $0x11c] sm:$0xf0]  ;;  %v2470_v55 = vld [vmem:[%s4374_s1 + $0x120] sm:$0xf0]  ;;  %v2891_v57 = vld [vmem:[%s4374_s1 + $0x124] sm:$0xf0] }
  0x39   : > { %1815 = vmatpush.bf16.msrb.mxu3 %v421_v0  ;;  %v2887_v58 = vld [vmem:[%s4374_s1 + $0x10c] sm:$0xf]  ;;  %v2469_v60 = vor.u32 %v2890_v53, %v2468_v52  ;;  %v2473_v61 = vor.u32 %v2886_v54, %v2470_v55  ;;  %v2477_v62 = vor.u32 %v2891_v57, %v2476_v56  ;;  %v335_v0 = vld [vmem:[%s3076_s19 + $0x340] sm:$0xff]  ;;  %v2508_v16 = vld [vmem:[%s4374_s1 + $0x148] sm:$0xf] }
  0x3a   : > { %1549 = vmatpush.bf16.msrb.mxu0 %v396_v35  ;;  %v2478_v59 = vld [vmem:[%s4374_s1 + $0x128] sm:$0xf0]  ;;  %v303_v2 = vld [vmem:[%s3076_s19 + $0x240] sm:$0xff]  ;;  %v2899_v17 = vld [vmem:[%s4374_s1 + $0x164] sm:$0xf0] }
  0x3b   : > { %1638 = vmatpush.bf16.msrb.mxu1 %v404_v39  ;;  %v2481_v63 = vor.u32 %v2887_v58, %v2478_v59  ;;  %v336_v1 = vld [vmem:[%s3076_s19 + $0x348] sm:$0xff]  ;;  %v351_v5 = vld [vmem:[%s3076_s19 + $0x3c0] sm:$0xff]  ;;  %v2509_v22 = vor.u32 %v2899_v17, %v2508_v16  ;;  %v334_v37 = vld [vmem:[%s3076_s19 + $0x338] sm:$0xff] }
  0x3c   : > { %1727 = vmatpush.bf16.msrb.mxu2 %v412_v31  ;;  %v411_v3 = vpack.c.bf16 %v336_v1, %v335_v0  ;;  %v304_v4 = vld [vmem:[%s3076_s19 + $0x248] sm:$0xff]  ;;  %v319_v9 = vld [vmem:[%s3076_s19 + $0x2c0] sm:$0xff]  ;;  %v301_v38 = vld [vmem:[%s3076_s19 + $0x230] sm:$0xff] }
  0x3d   : > { %1816 = vmatpush.bf16.msrb.mxu3 %v420_v36  ;;  %v352_v6 = vld [vmem:[%s3076_s19 + $0x3c8] sm:$0xff]  ;;  %v395_v7 = vpack.c.bf16 %v304_v4, %v303_v2  ;;  %v333_v36 = vld [vmem:[%s3076_s19 + $0x330] sm:$0xff]  ;;  %v302_v40 = vld [vmem:[%s3076_s19 + $0x238] sm:$0xff] }
  0x3e   : > { %v419_v8 = vpack.c.bf16 %v352_v6, %v351_v5  ;;  %v320_v10 = vld [vmem:[%s3076_s19 + $0x2c8] sm:$0xff]  ;;  %v410_v39 = vpack.c.bf16 %v334_v37, %v333_v36  ;;  %v349_v41 = vld [vmem:[%s3076_s19 + $0x3b0] sm:$0xff]  ;;  %v350_v42 = vld [vmem:[%s3076_s19 + $0x3b8] sm:$0xff]  ;;  %v394_v43 = vpack.c.bf16 %v302_v40, %v301_v38 }
  0x3f   : > { %v403_v11 = vpack.c.bf16 %v320_v10, %v319_v9  ;;  %1550 = vmatpush.bf16.msrb.mxu0 %v395_v7  ;;  %v2895_v18 = vld [vmem:[%s4374_s1 + $0x14c] sm:$0xf]  ;;  %v2540_v28 = vld [vmem:[%s4374_s1 + $0x188] sm:$0xf]  ;;  %v418_v44 = vpack.c.bf16 %v350_v42, %v349_v41  ;;  %v317_v45 = vld [vmem:[%s3076_s19 + $0x2b0] sm:$0xff] }
  0x40   : > { %1728 = vmatpush.bf16.msrb.mxu2 %v411_v3  ;;  %v2510_v19 = vld [vmem:[%s4374_s1 + $0x168] sm:$0xf0]  ;;  %v2907_v29 = vld [vmem:[%s4374_s1 + $0x1a4] sm:$0xf0]  ;;  %v318_v46 = vld [vmem:[%s3076_s19 + $0x2b8] sm:$0xff] }
  0x41   : > { %1204 = vmatmul.bf16.gmra.mxu0 %v2373_v12  ;;  %1817 = vmatpush.bf16.msrb.mxu3 %v419_v8  ;;  %v2500_v12 = vld [vmem:[%s4374_s1 + $0x140] sm:$0xf]  ;;  %v2513_v23 = vor.u32 %v2895_v18, %v2510_v19  ;;  %v2903_v30 = vld [vmem:[%s4374_s1 + $0x18c] sm:$0xf]  ;;  %v2541_v34 = vor.u32 %v2907_v29, %v2540_v28  ;;  %v402_v47 = vpack.c.bf16 %v318_v46, %v317_v45  ;;  %v2572_v52 = vld [vmem:[%s4374_s1 + $0x1c8] sm:$0xf] }
  0x42   : > { %1293 = vmatmul.bf16.gmra.mxu1 %v2377_v13  ;;  %v2898_v13 = vld [vmem:[%s4374_s1 + $0x15c] sm:$0xf0]  ;;  %v2542_v31 = vld [vmem:[%s4374_s1 + $0x1a8] sm:$0xf0]  ;;  %v2915_v53 = vld [vmem:[%s4374_s1 + $0x1e4] sm:$0xf0] }
  0x43   : > { %1382 = vmatmul.bf16.gmra.mxu2 %v2381_v14  ;;  %1639 = vmatpush.bf16.msrb.mxu1 %v403_v11  ;;  %v2894_v14 = vld [vmem:[%s4374_s1 + $0x144] sm:$0xf]  ;;  %v2501_v20 = vor.u32 %v2898_v13, %v2500_v12  ;;  %v2545_v35 = vor.u32 %v2903_v30, %v2542_v31  ;;  %v2911_v54 = vld [vmem:[%s4374_s1 + $0x1cc] sm:$0xf]  ;;  %v2573_v58 = vor.u32 %v2915_v53, %v2572_v52  ;;  %v2604_v0 = vld [vmem:[%s4374_s1 + $0x208] sm:$0xf] }
  0x44   : > { %1471 = vmatmul.bf16.gmra.mxu3 %v2385_v15  ;;  %v2502_v15 = vld [vmem:[%s4374_s1 + $0x160] sm:$0xf0]  ;;  %1729 = vmatpush.bf16.msrb.mxu2 %v410_v39  ;;  %v2574_v55 = vld [vmem:[%s4374_s1 + $0x1e8] sm:$0xf0]  ;;  %v2923_v1 = vld [vmem:[%s4374_s1 + $0x224] sm:$0xf0] }
  0x45   : > { %v2505_v21 = vor.u32 %v2894_v14, %v2502_v15  ;;  %1551 = vmatpush.bf16.msrb.mxu0 %v394_v43  ;;  %1818 = vmatpush.bf16.msrb.mxu3 %v418_v44  ;;  %v2577_v59 = vor.u32 %v2911_v54, %v2574_v55  ;;  %v2919_v2 = vld [vmem:[%s4374_s1 + $0x20c] sm:$0xf]  ;;  %v2605_v7 = vor.u32 %v2923_v1, %v2604_v0  ;;  %v331_v11 = vld [vmem:[%s3076_s19 + $0x320] sm:$0xff] }
  0x46   : > { %v2606_v3 = vld [vmem:[%s4374_s1 + $0x228] sm:$0xf0]  ;;  %v299_v13 = vld [vmem:[%s3076_s19 + $0x220] sm:$0xff] }
  0x47   : > { %1640 = vmatpush.bf16.msrb.mxu1 %v402_v47  ;;  %v2609_v9 = vor.u32 %v2919_v2, %v2606_v3  ;;  %v332_v12 = vld [vmem:[%s3076_s19 + $0x328] sm:$0xff]  ;;  %v347_v16 = vld [vmem:[%s3076_s19 + $0x3a0] sm:$0xff] }
  0x48   : > { %v409_v14 = vpack.c.bf16 %v332_v12, %v331_v11  ;;  %v300_v15 = vld [vmem:[%s3076_s19 + $0x228] sm:$0xff]  ;;  %v2628_v30 = vld [vmem:[%s4374_s1 + $0x240] sm:$0xf]  ;;  %v329_v11 = vld [vmem:[%s3076_s19 + $0x310] sm:$0xff] }
  0x49   : > { %v348_v17 = vld [vmem:[%s3076_s19 + $0x3a8] sm:$0xff]  ;;  %v393_v19 = vpack.c.bf16 %v300_v15, %v299_v13  ;;  %v2930_v31 = vld [vmem:[%s4374_s1 + $0x25c] sm:$0xf0]  ;;  %v330_v12 = vld [vmem:[%s3076_s19 + $0x318] sm:$0xff] }
  0x4a   : > { %1730 = vmatpush.bf16.msrb.mxu2 %v409_v14  ;;  %v316_v28 = vld [vmem:[%s3076_s19 + $0x2a8] sm:$0xff]  ;;  %v2629_v39 = vor.u32 %v2930_v31, %v2628_v30  ;;  %v297_v13 = vld [vmem:[%s3076_s19 + $0x210] sm:$0xff]  ;;  %v408_v14 = vpack.c.bf16 %v330_v12, %v329_v11  ;;  %v298_v15 = vld [vmem:[%s3076_s19 + $0x218] sm:$0xff] }
  0x4b   : > { %1552 = vmatpush.bf16.msrb.mxu0 %v393_v19  ;;  %v2927_v36 = vld [vmem:[%s4374_s1 + $0x24c] sm:$0xf]  ;;  %v392_v19 = vpack.c.bf16 %v298_v15, %v297_v13  ;;  %v2692_v31 = vld [vmem:[%s4374_s1 + $0x2c0] sm:$0xf] }
  0x4c   : > { %v2638_v37 = vld [vmem:[%s4374_s1 + $0x268] sm:$0xf0]  ;;  %v327_v15 = vld [vmem:[%s3076_s19 + $0x300] sm:$0xff] }
  0x4d   : > { %v2641_v46 = vor.u32 %v2927_v36, %v2638_v37  ;;  %v2947_v36 = vld [vmem:[%s4374_s1 + $0x2e4] sm:$0xf0]  ;;  %v2943_v37 = vld [vmem:[%s4374_s1 + $0x2cc] sm:$0xf] }
  0x4e   : > { %1731 = vmatpush.bf16.msrb.mxu2 %v408_v14 }
  0x4f   : > { %1553 = vmatpush.bf16.msrb.mxu0 %v392_v19  ;;  %v296_v19 = vld [vmem:[%s3076_s19 + $0x208] sm:$0xff] }
  0x51   : > { %1209 = vmatmul.bf16.gmra.mxu0 %v2405_v24  ;;  %v2532_v24 = vld [vmem:[%s4374_s1 + $0x180] sm:$0xf] }
  0x52   : > { %1298 = vmatmul.bf16.gmra.mxu1 %v2409_v25  ;;  %v2906_v25 = vld [vmem:[%s4374_s1 + $0x19c] sm:$0xf0] }
  0x53   : > { %1387 = vmatmul.bf16.gmra.mxu2 %v2413_v26  ;;  %v2902_v26 = vld [vmem:[%s4374_s1 + $0x184] sm:$0xf]  ;;  %v2533_v32 = vor.u32 %v2906_v25, %v2532_v24 }
  0x54   : > { %1476 = vmatmul.bf16.gmra.mxu3 %v2417_v27  ;;  %v2534_v27 = vld [vmem:[%s4374_s1 + $0x1a0] sm:$0xf0] }
  0x55   : > { %v2537_v33 = vor.u32 %v2902_v26, %v2534_v27  ;;  %v315_v27 = vld [vmem:[%s3076_s19 + $0x2a0] sm:$0xff] }
  0x56   : > { %v401_v29 = vpack.c.bf16 %v316_v28, %v315_v27  ;;  %v313_v28 = vld [vmem:[%s3076_s19 + $0x290] sm:$0xff] }
  0x58   : > { %1641 = vmatpush.bf16.msrb.mxu1 %v401_v29  ;;  %v314_v29 = vld [vmem:[%s3076_s19 + $0x298] sm:$0xff] }
  0x59   : > { %v400_v30 = vpack.c.bf16 %v314_v29, %v313_v28 }
  0x5c   : > { %1642 = vmatpush.bf16.msrb.mxu1 %v400_v30 }
  0x61   : > { %1214 = vmatmul.bf16.gmra.mxu0 %v2437_v48  ;;  %v2564_v48 = vld [vmem:[%s4374_s1 + $0x1c0] sm:$0xf] }
  0x62   : > { %1303 = vmatmul.bf16.gmra.mxu1 %v2441_v49  ;;  %v2914_v49 = vld [vmem:[%s4374_s1 + $0x1dc] sm:$0xf0] }
  0x63   : > { %1392 = vmatmul.bf16.gmra.mxu2 %v2445_v50  ;;  %v2910_v50 = vld [vmem:[%s4374_s1 + $0x1c4] sm:$0xf]  ;;  %v2565_v56 = vor.u32 %v2914_v49, %v2564_v48 }
  0x64   : > { %1481 = vmatmul.bf16.gmra.mxu3 %v2449_v51  ;;  %v2566_v51 = vld [vmem:[%s4374_s1 + $0x1e0] sm:$0xf0] }
  0x65   : > { %v2569_v57 = vor.u32 %v2910_v50, %v2566_v51 }
  0x71   : > { %1219 = vmatmul.bf16.gmra.mxu0 %v2469_v60  ;;  %v2596_v60 = vld [vmem:[%s4374_s1 + $0x200] sm:$0xf] }
  0x72   : > { %1308 = vmatmul.bf16.gmra.mxu1 %v2473_v61  ;;  %v2922_v61 = vld [vmem:[%s4374_s1 + $0x21c] sm:$0xf0] }
  0x73   : > { %1397 = vmatmul.bf16.gmra.mxu2 %v2477_v62  ;;  %v2918_v62 = vld [vmem:[%s4374_s1 + $0x204] sm:$0xf]  ;;  %v2597_v4 = vor.u32 %v2922_v61, %v2596_v60  ;;  %v2668_v60 = vld [vmem:[%s4374_s1 + $0x288] sm:$0xf] }
  0x74   : > { %1486 = vmatmul.bf16.gmra.mxu3 %v2481_v63  ;;  %v2598_v63 = vld [vmem:[%s4374_s1 + $0x220] sm:$0xf0]  ;;  %v2939_v61 = vld [vmem:[%s4374_s1 + $0x2a4] sm:$0xf0] }
  0x75   : > { %v2601_v6 = vor.u32 %v2918_v62, %v2598_v63  ;;  %v2935_v62 = vld [vmem:[%s4374_s1 + $0x28c] sm:$0xf] }
  0x76   : > { %v2670_v63 = vld [vmem:[%s4374_s1 + $0x2a8] sm:$0xf0] }
  0x81   : > { %1224 = vmatmul.bf16.gmra.mxu0 %v2501_v20  ;;  %v417_v20 = vpack.c.bf16 %v348_v17, %v347_v16  ;;  %v345_v16 = vld [vmem:[%s3076_s19 + $0x390] sm:$0xff]  ;;  %v346_v17 = vld [vmem:[%s3076_s19 + $0x398] sm:$0xff] }
  0x82   : > { %1313 = vmatmul.bf16.gmra.mxu1 %v2505_v21 }
  0x83   : > { %1402 = vmatmul.bf16.gmra.mxu2 %v2509_v22  ;;  %1819 = vmatpush.bf16.msrb.mxu3 %v417_v20  ;;  %v416_v20 = vpack.c.bf16 %v346_v17, %v345_v16  ;;  %v328_v16 = vld [vmem:[%s3076_s19 + $0x308] sm:$0xff]  ;;  %v295_v17 = vld [vmem:[%s3076_s19 + $0x200] sm:$0xff] }
  0x84   : > { %1491 = vmatmul.bf16.gmra.mxu3 %v2513_v23 }
  0x87   : > { %1820 = vmatpush.bf16.msrb.mxu3 %v416_v20  ;;  %v343_v20 = vld [vmem:[%s3076_s19 + $0x380] sm:$0xff] }
  0x91   : > { %1229 = vmatmul.bf16.gmra.mxu0 %v2533_v32  ;;  %v2926_v32 = vld [vmem:[%s4374_s1 + $0x244] sm:$0xf] }
  0x92   : > { %1318 = vmatmul.bf16.gmra.mxu1 %v2537_v33  ;;  %v2630_v33 = vld [vmem:[%s4374_s1 + $0x260] sm:$0xf0] }
  0x93   : > { %1407 = vmatmul.bf16.gmra.mxu2 %v2541_v34  ;;  %v2636_v34 = vld [vmem:[%s4374_s1 + $0x248] sm:$0xf]  ;;  %v2633_v43 = vor.u32 %v2926_v32, %v2630_v33  ;;  %v2946_v32 = vld [vmem:[%s4374_s1 + $0x2dc] sm:$0xf0]  ;;  %v2942_v33 = vld [vmem:[%s4374_s1 + $0x2c4] sm:$0xf] }
  0x94   : > { %1496 = vmatmul.bf16.gmra.mxu3 %v2545_v35  ;;  %v2931_v35 = vld [vmem:[%s4374_s1 + $0x264] sm:$0xf0] }
  0x95   : > { %v2637_v44 = vor.u32 %v2931_v35, %v2636_v34  ;;  %v2694_v34 = vld [vmem:[%s4374_s1 + $0x2e0] sm:$0xf0]  ;;  %v2700_v35 = vld [vmem:[%s4374_s1 + $0x2c8] sm:$0xf] }
  0xa1   : > { %1234 = vmatmul.bf16.gmra.mxu0 %v2565_v56  ;;  %v2660_v56 = vld [vmem:[%s4374_s1 + $0x280] sm:$0xf] }
  0xa2   : > { %1323 = vmatmul.bf16.gmra.mxu1 %v2569_v57  ;;  %v2938_v57 = vld [vmem:[%s4374_s1 + $0x29c] sm:$0xf0] }
  0xa3   : > { %1412 = vmatmul.bf16.gmra.mxu2 %v2573_v58  ;;  %v2934_v58 = vld [vmem:[%s4374_s1 + $0x284] sm:$0xf]  ;;  %v2661_v1 = vor.u32 %v2938_v57, %v2660_v56 }
  0xa4   : > { %1501 = vmatmul.bf16.gmra.mxu3 %v2577_v59  ;;  %v2662_v59 = vld [vmem:[%s4374_s1 + $0x2a0] sm:$0xf0] }
  0xae   : > { %v1200_v5 = vpop.f32.mrf.mxu0 }
  0xaf   : > { %v1289_v8 = vpop.f32.mrf.mxu1 }
  0xb0   : > { %v1290_v10 = vadd.f32 %v1289_v8, %v1200_v5  ;;  %v2665_v5 = vor.u32 %v2934_v58, %v2662_v59  ;;  %v2673_v8 = vor.u32 %v2935_v62, %v2670_v63  ;;  %v2724_v59 = vld [vmem:[%s4374_s1 + $0x300] sm:$0xf]  ;;  %v2726_v62 = vld [vmem:[%s4374_s1 + $0x320] sm:$0xf0]  ;;  %v2732_v63 = vld [vmem:[%s4374_s1 + $0x308] sm:$0xf] }
  0xb1   : > { %1239 = vmatmul.bf16.gmra.mxu0 %v2597_v4 }
  0xb2   : > { %1328 = vmatmul.bf16.gmra.mxu1 %v2601_v6  ;;  %v2669_v6 = vor.u32 %v2939_v61, %v2668_v60  ;;  %v2954_v60 = vld [vmem:[%s4374_s1 + $0x31c] sm:$0xf0]  ;;  %v2950_v61 = vld [vmem:[%s4374_s1 + $0x304] sm:$0xf] }
  0xb3   : > { %1417 = vmatmul.bf16.gmra.mxu2 %v2605_v7 }
  0xb4   : > { %1506 = vmatmul.bf16.gmra.mxu3 %v2609_v9 }
  0xb6   : > { %v1378_v18 = vpop.f32.mrf.mxu2  ;;  %v1202_v23 = vpop.f32.mrf.mxu0 }
  0xb7   : > { %v1379_v21 = vadd.f32 %v1378_v18, %v1290_v10  ;;  %v1467_v22 = vpop.f32.mrf.mxu3  ;;  %v1291_v24 = vpop.f32.mrf.mxu1 }
  0xb8   : > { %v1292_v26 = vadd.f32 %v1291_v24, %v1202_v23 }
  0xb9   : > { %v3404_v25 = vadd.f32 %v1467_v22, %v1379_v21 }
  0xbe   : > { %v1380_v38 = vpop.f32.mrf.mxu2  ;;  %v1205_v42 = vpop.f32.mrf.mxu0 }
  0xbf   : > { %v1381_v40 = vadd.f32 %v1380_v38, %v1292_v26  ;;  %v1469_v41 = vpop.f32.mrf.mxu3  ;;  %v1294_v45 = vpop.f32.mrf.mxu1  ;;  %v2702_v38 = vld [vmem:[%s4374_s1 + $0x2e8] sm:$0xf0] }
  0xc0   : > { %v1295_v48 = vadd.f32 %v1294_v45, %v1205_v42  ;;  %v2701_v45 = vor.u32 %v2947_v36, %v2700_v35  ;;  %v2756_v36 = vld [vmem:[%s4374_s1 + $0x340] sm:$0xf] }
  0xc1   : > { %v3432_v47 = vadd.f32 %v1469_v41, %v1381_v40  ;;  %1244 = vmatmul.bf16.gmra.mxu0 %v2629_v39  ;;  %v2693_v40 = vor.u32 %v2946_v32, %v2692_v31 }
  0xc2   : > { %1333 = vmatmul.bf16.gmra.mxu1 %v2633_v43 }
  0xc3   : > { %1422 = vmatmul.bf16.gmra.mxu2 %v2637_v44  ;;  %v2697_v44 = vor.u32 %v2942_v33, %v2694_v34  ;;  %v311_v33 = vld [vmem:[%s3076_s19 + $0x280] sm:$0xff]  ;;  %v312_v34 = vld [vmem:[%s3076_s19 + $0x288] sm:$0xff] }
  0xc4   : > { %1511 = vmatmul.bf16.gmra.mxu3 %v2641_v46  ;;  %v399_v35 = vpack.c.bf16 %v312_v34, %v311_v33  ;;  %v2820_v33 = vld [vmem:[%s4374_s1 + $0x3c0] sm:$0xf] }
  0xc5   : > { %v2978_v34 = vld [vmem:[%s4374_s1 + $0x3dc] sm:$0xf0] }
  0xc6   : > { %v1383_v49 = vpop.f32.mrf.mxu2  ;;  %v1207_v52 = vpop.f32.mrf.mxu0  ;;  %1643 = vmatpush.bf16.msrb.mxu1 %v399_v35  ;;  %v2974_v35 = vld [vmem:[%s4374_s1 + $0x3c4] sm:$0xf] }
  0xc7   : > { %v1384_v50 = vadd.f32 %v1383_v49, %v1295_v48  ;;  %v1472_v51 = vpop.f32.mrf.mxu3  ;;  %v1296_v53 = vpop.f32.mrf.mxu1  ;;  %v2705_v48 = vor.u32 %v2943_v37, %v2702_v38  ;;  %v2962_v37 = vld [vmem:[%s4374_s1 + $0x35c] sm:$0xf0]  ;;  %v2958_v38 = vld [vmem:[%s4374_s1 + $0x344] sm:$0xf] }
  0xc8   : > { %v1297_v55 = vadd.f32 %v1296_v53, %v1207_v52 }
  0xc9   : > { %v3434_v54 = vadd.f32 %v1472_v51, %v1384_v50 }
  0xce   : > { %v1385_v0 = vpop.f32.mrf.mxu2  ;;  %v1210_v4 = vpop.f32.mrf.mxu0 }
  0xcf   : > { %v1386_v2 = vadd.f32 %v1385_v0, %v1297_v55  ;;  %v1474_v3 = vpop.f32.mrf.mxu3  ;;  %v1299_v7 = vpop.f32.mrf.mxu1  ;;  %v2955_v0 = vld [vmem:[%s4374_s1 + $0x324] sm:$0xf0] }
  0xd0   : > { %v1300_v10 = vadd.f32 %v1299_v7, %v1210_v4  ;;  %v2725_v4 = vor.u32 %v2954_v60, %v2724_v59 }
  0xd1   : > { %v3460_v9 = vadd.f32 %v1474_v3, %v1386_v2  ;;  %1249 = vmatmul.bf16.gmra.mxu0 %v2661_v1  ;;  %v2951_v1 = vld [vmem:[%s4374_s1 + $0x30c] sm:$0xf] }
  0xd2   : > { %1338 = vmatmul.bf16.gmra.mxu1 %v2665_v5  ;;  %v2734_v2 = vld [vmem:[%s4374_s1 + $0x328] sm:$0xf0] }
  0xd3   : > { %1427 = vmatmul.bf16.gmra.mxu2 %v2669_v6  ;;  %v2737_v12 = vor.u32 %v2951_v1, %v2734_v2  ;;  %v2788_v2 = vld [vmem:[%s4374_s1 + $0x380] sm:$0xf] }
  0xd4   : > { %1516 = vmatmul.bf16.gmra.mxu3 %v2673_v8  ;;  %v2729_v8 = vor.u32 %v2950_v61, %v2726_v62 }
  0xd6   : > { %v1388_v18 = vpop.f32.mrf.mxu2  ;;  %v1212_v23 = vpop.f32.mrf.mxu0 }
  0xd7   : > { %v1389_v21 = vadd.f32 %v1388_v18, %v1300_v10  ;;  %v1477_v22 = vpop.f32.mrf.mxu3  ;;  %v1301_v24 = vpop.f32.mrf.mxu1  ;;  %v2733_v10 = vor.u32 %v2955_v0, %v2732_v63  ;;  %v407_v18 = vpack.c.bf16 %v328_v16, %v327_v15 }
  0xd8   : > { %v1302_v27 = vadd.f32 %v1301_v24, %v1212_v23  ;;  %v391_v23 = vpack.c.bf16 %v296_v19, %v295_v17 }
  0xd9   : > { %v3468_v26 = vadd.f32 %v1477_v22, %v1389_v21  ;;  %v344_v21 = vld [vmem:[%s3076_s19 + $0x388] sm:$0xff]  ;;  %1732 = vmatpush.bf16.msrb.mxu2 %v407_v18  ;;  %s4145_s19 = scalar_lea.vmem %s4376_s3, %s2853_s10 }
  0xda   : > { %v415_v24 = vpack.c.bf16 %v344_v21, %v343_v20  ;;  %1554 = vmatpush.bf16.msrb.mxu0 %v391_v23 }
  0xdc   : > { %1821 = vmatpush.bf16.msrb.mxu3 %v415_v24 }
  0xde   : > { %v1390_v39 = vpop.f32.mrf.mxu2  ;;  %v1215_v43 = vpop.f32.mrf.mxu0 }
  0xdf   : > { %v1391_v41 = vadd.f32 %v1390_v39, %v1302_v27  ;;  %v1479_v42 = vpop.f32.mrf.mxu3  ;;  %v1304_v46 = vpop.f32.mrf.mxu1  ;;  %v2758_v39 = vld [vmem:[%s4374_s1 + $0x360] sm:$0xf0] }
  0xe0   : > { %v1305_v50 = vadd.f32 %v1304_v46, %v1215_v43  ;;  %v2766_v43 = vld [vmem:[%s4374_s1 + $0x368] sm:$0xf0] }
  0xe1   : > { %v3496_v49 = vadd.f32 %v1479_v42, %v1391_v41  ;;  %1254 = vmatmul.bf16.gmra.mxu0 %v2693_v40  ;;  %v2764_v40 = vld [vmem:[%s4374_s1 + $0x348] sm:$0xf]  ;;  %v2959_v42 = vld [vmem:[%s4374_s1 + $0x34c] sm:$0xf] }
  0xe2   : > { %1343 = vmatmul.bf16.gmra.mxu1 %v2697_v44  ;;  %v2963_v41 = vld [vmem:[%s4374_s1 + $0x364] sm:$0xf0] }
  0xe3   : > { %1432 = vmatmul.bf16.gmra.mxu2 %v2701_v45  ;;  %v2757_v45 = vor.u32 %v2962_v37, %v2756_v36  ;;  %v2822_v36 = vld [vmem:[%s4374_s1 + $0x3e0] sm:$0xf0]  ;;  %v2828_v37 = vld [vmem:[%s4374_s1 + $0x3c8] sm:$0xf] }
  0xe4   : > { %1521 = vmatmul.bf16.gmra.mxu3 %v2705_v48 }
  0xe6   : > { %v1393_v51 = vpop.f32.mrf.mxu2  ;;  %v1217_v55 = vpop.f32.mrf.mxu0 }
  0xe7   : > { %v1394_v52 = vadd.f32 %v1393_v51, %v1305_v50  ;;  %v1482_v53 = vpop.f32.mrf.mxu3  ;;  %v1306_v56 = vpop.f32.mrf.mxu1  ;;  %v2761_v51 = vor.u32 %v2958_v38, %v2758_v39  ;;  %v2979_v38 = vld [vmem:[%s4374_s1 + $0x3e4] sm:$0xf0]  ;;  %v2975_v39 = vld [vmem:[%s4374_s1 + $0x3cc] sm:$0xf] }
  0xe8   : > { %v1307_v58 = vadd.f32 %v1306_v56, %v1217_v55  ;;  %v2769_v55 = vor.u32 %v2959_v42, %v2766_v43  ;;  %v2821_v42 = vor.u32 %v2978_v34, %v2820_v33  ;;  %v2388_v34 = vld [vmem:[%s4374_s1 + $0x50] sm:$0xf] }
  0xe9   : > { %v3498_v57 = vadd.f32 %v1482_v53, %v1394_v52  ;;  %v2765_v52 = vor.u32 %v2963_v41, %v2764_v40  ;;  %v2830_v40 = vld [vmem:[%s4374_s1 + $0x3e8] sm:$0xf0] }
  0xee   : > { %v1395_v3 = vpop.f32.mrf.mxu2  ;;  %v1220_v7 = vpop.f32.mrf.mxu0 }
  0xef   : > { %v1396_v5 = vadd.f32 %v1395_v3, %v1307_v58  ;;  %v1484_v6 = vpop.f32.mrf.mxu3  ;;  %v1309_v11 = vpop.f32.mrf.mxu1  ;;  %v2970_v3 = vld [vmem:[%s4374_s1 + $0x39c] sm:$0xf0] }
  0xf0   : > { %v1310_v14 = vadd.f32 %v1309_v11, %v1220_v7  ;;  %v2971_v7 = vld [vmem:[%s4374_s1 + $0x3a4] sm:$0xf0] }
  0xf1   : > { %v3524_v13 = vadd.f32 %v1484_v6, %v1396_v5  ;;  %1259 = vmatmul.bf16.gmra.mxu0 %v2725_v4  ;;  %v2966_v4 = vld [vmem:[%s4374_s1 + $0x384] sm:$0xf]  ;;  %v2796_v6 = vld [vmem:[%s4374_s1 + $0x388] sm:$0xf] }
  0xf2   : > { %1348 = vmatmul.bf16.gmra.mxu1 %v2729_v8  ;;  %v2790_v5 = vld [vmem:[%s4374_s1 + $0x3a0] sm:$0xf0]  ;;  %v2967_v8 = vld [vmem:[%s4374_s1 + $0x38c] sm:$0xf]  ;;  %v2797_v18 = vor.u32 %v2971_v7, %v2796_v6  ;;  %v2861_v6 = vld [vmem:[%s4374_s1 + $0x34] sm:$0xf0] }
  0xf3   : > { %1437 = vmatmul.bf16.gmra.mxu2 %v2733_v10  ;;  %v2798_v10 = vld [vmem:[%s4374_s1 + $0x3a8] sm:$0xf0]  ;;  %v2793_v17 = vor.u32 %v2966_v4, %v2790_v5  ;;  %v2358_v4 = vld [vmem:[%s4374_s1 + $0x30] sm:$0xf0]  ;;  %v2364_v5 = vld [vmem:[%s4374_s1 + $0x18] sm:$0xf] }
  0xf4   : > { %1526 = vmatmul.bf16.gmra.mxu3 %v2737_v12  ;;  %v2789_v12 = vor.u32 %v2970_v3, %v2788_v2  ;;  %v2801_v20 = vor.u32 %v2967_v8, %v2798_v10  ;;  %v2860_v2 = vld [vmem:[%s4374_s1 + $0x2c] sm:$0xf0]  ;;  %v2856_v3 = vld [vmem:[%s4374_s1 + $0x14] sm:$0xf]  ;;  %v2857_v7 = vld [vmem:[%s4374_s1 + $0x1c] sm:$0xf] }
  0xf5   : > { %v2366_v8 = vld [vmem:[%s4374_s1 + $0x38] sm:$0xf0] }
  0xf6   : > { %v1398_v22 = vpop.f32.mrf.mxu2  ;;  %v1222_v29 = vpop.f32.mrf.mxu0 }
  0xf7   : > { %v1399_v27 = vadd.f32 %v1398_v22, %v1310_v14  ;;  %v1487_v28 = vpop.f32.mrf.mxu3  ;;  %v1311_v30 = vpop.f32.mrf.mxu1 }
  0xf8   : > { %v1312_v32 = vadd.f32 %v1311_v30, %v1222_v29 }
  0xf9   : > { %v3532_v31 = vadd.f32 %v1487_v28, %v1399_v27 }
  0xfe   : > { %v1400_v44 = vpop.f32.mrf.mxu2  ;;  %v1225_v50 = vpop.f32.mrf.mxu0 }
  0xff   : > { %v1401_v46 = vadd.f32 %v1400_v44, %v1312_v32  ;;  %v1489_v48 = vpop.f32.mrf.mxu3  ;;  %v1314_v53 = vpop.f32.mrf.mxu1 }
 0x100   : > { %v1315_v58 = vadd.f32 %v1314_v53, %v1225_v50 }
 0x101   : > { %v3560_v56 = vadd.f32 %v1489_v48, %v1401_v46  ;;  %1264 = vmatmul.bf16.gmra.mxu0 %v2757_v45  ;;  %v2825_v46 = vor.u32 %v2974_v35, %v2822_v36  ;;  %v2829_v48 = vor.u32 %v2979_v38, %v2828_v37  ;;  %v2868_v35 = vld [vmem:[%s4374_s1 + $0x6c] sm:$0xf0]  ;;  %v2864_v36 = vld [vmem:[%s4374_s1 + $0x54] sm:$0xf]  ;;  %v2396_v38 = vld [vmem:[%s4374_s1 + $0x58] sm:$0xf] }
 0x102   : > { %1353 = vmatmul.bf16.gmra.mxu1 %v2761_v51  ;;  %v2833_v51 = vor.u32 %v2975_v39, %v2830_v40  ;;  %v2390_v37 = vld [vmem:[%s4374_s1 + $0x70] sm:$0xf0]  ;;  %v2869_v39 = vld [vmem:[%s4374_s1 + $0x74] sm:$0xf0]  ;;  %v2865_v40 = vld [vmem:[%s4374_s1 + $0x5c] sm:$0xf] }
 0x103   : > { %1442 = vmatmul.bf16.gmra.mxu2 %v2765_v52 }
 0x104   : > { %1531 = vmatmul.bf16.gmra.mxu3 %v2769_v55 }
 0x106   : > { %v1403_v59 = vpop.f32.mrf.mxu2  ;;  %v1227_v62 = vpop.f32.mrf.mxu0 }
 0x107   : > { %v1404_v60 = vadd.f32 %v1403_v59, %v1315_v58  ;;  %v1492_v61 = vpop.f32.mrf.mxu3  ;;  %v1316_v63 = vpop.f32.mrf.mxu1 }
 0x108   : > { %v1317_v1 = vadd.f32 %v1316_v63, %v1227_v62 }
 0x109   : > { %v3562_v0 = vadd.f32 %v1492_v61, %v1404_v60 }
 0x10e   : > { %v1405_v11 = vpop.f32.mrf.mxu2  ;;  %v1230_v16 = vpop.f32.mrf.mxu0 }
 0x10f   : > { %v1406_v14 = vadd.f32 %v1405_v11, %v1317_v1  ;;  %v1494_v15 = vpop.f32.mrf.mxu3  ;;  %v1319_v19 = vpop.f32.mrf.mxu1  ;;  %v2356_v1 = vld [vmem:[%s4374_s1 + $0x10] sm:$0xf] }
 0x110   : > { %v1320_v22 = vadd.f32 %v1319_v19, %v1230_v16  ;;  %v2357_v11 = vor.u32 %v2860_v2, %v2356_v1  ;;  %v2361_v16 = vor.u32 %v2856_v3, %v2358_v4  ;;  %v2369_v19 = vor.u32 %v2857_v7, %v2366_v8  ;;  %v2420_v4 = vld [vmem:[%s4374_s1 + $0x90] sm:$0xf]  ;;  %v2422_v7 = vld [vmem:[%s4374_s1 + $0xb0] sm:$0xf0]  ;;  %v2428_v8 = vld [vmem:[%s4374_s1 + $0x98] sm:$0xf] }
 0x111   : > { %v3588_v21 = vadd.f32 %v1494_v15, %v1406_v14  ;;  %1269 = vmatmul.bf16.gmra.mxu0 %v2789_v12 }
 0x112   : > { %1358 = vmatmul.bf16.gmra.mxu1 %v2793_v17  ;;  %v2365_v17 = vor.u32 %v2861_v6, %v2364_v5  ;;  %v2876_v5 = vld [vmem:[%s4374_s1 + $0xac] sm:$0xf0]  ;;  %v2872_v6 = vld [vmem:[%s4374_s1 + $0x94] sm:$0xf] }
 0x113   : > { %1447 = vmatmul.bf16.gmra.mxu2 %v2797_v18 }
 0x114   : > { %1536 = vmatmul.bf16.gmra.mxu3 %v2801_v20 }
 0x116   : > { %v1408_v23 = vpop.f32.mrf.mxu2  ;;  %v1232_v28 = vpop.f32.mrf.mxu0 }
 0x117   : > { %v1409_v24 = vadd.f32 %v1408_v23, %v1320_v22  ;;  %v1497_v27 = vpop.f32.mrf.mxu3  ;;  %v1321_v29 = vpop.f32.mrf.mxu1 }
 0x118   : > { %v1322_v32 = vadd.f32 %v1321_v29, %v1232_v28 }
 0x119   : > { %v3590_v30 = vadd.f32 %v1497_v27, %v1409_v24 }
 0x11e   : > { %v1410_v41 = vpop.f32.mrf.mxu2  ;;  %v1235_v45 = vpop.f32.mrf.mxu0 }
 0x11f   : > { %v1411_v43 = vadd.f32 %v1410_v41, %v1322_v32  ;;  %v1499_v44 = vpop.f32.mrf.mxu3  ;;  %v1324_v50 = vpop.f32.mrf.mxu1  ;;  %v2398_v41 = vld [vmem:[%s4374_s1 + $0x78] sm:$0xf0] }
 0x120   : > { %v1325_v53 = vadd.f32 %v1324_v50, %v1235_v45  ;;  %v2397_v50 = vor.u32 %v2869_v39, %v2396_v38  ;;  %v2452_v39 = vld [vmem:[%s4374_s1 + $0xd0] sm:$0xf] }
 0x121   : > { %v3616_v52 = vadd.f32 %v1499_v44, %v1411_v43  ;;  %1274 = vmatmul.bf16.gmra.mxu0 %v2821_v42  ;;  %v2389_v43 = vor.u32 %v2868_v35, %v2388_v34 }
 0x122   : > { %1363 = vmatmul.bf16.gmra.mxu1 %v2825_v46 }
 0x123   : > { %1452 = vmatmul.bf16.gmra.mxu2 %v2829_v48  ;;  %v2393_v48 = vor.u32 %v2864_v36, %v2390_v37 }
 0x124   : > { %1541 = vmatmul.bf16.gmra.mxu3 %v2833_v51 }
 0x126   : > { %v1413_v55 = vpop.f32.mrf.mxu2  ;;  %v1237_v60 = vpop.f32.mrf.mxu0 }
 0x127   : > { %v1414_v58 = vadd.f32 %v1413_v55, %v1325_v53  ;;  %v1502_v59 = vpop.f32.mrf.mxu3  ;;  %v1326_v61 = vpop.f32.mrf.mxu1  ;;  %v2401_v53 = vor.u32 %v2865_v40, %v2398_v41  ;;  %v2884_v40 = vld [vmem:[%s4374_s1 + $0xec] sm:$0xf0]  ;;  %v2880_v41 = vld [vmem:[%s4374_s1 + $0xd4] sm:$0xf] }
 0x128   : > { %v1327_v63 = vadd.f32 %v1326_v61, %v1237_v60 }
 0x129   : > { %v3618_v62 = vadd.f32 %v1502_v59, %v1414_v58 }
 0x12e   : > { %v1415_v10 = vpop.f32.mrf.mxu2  ;;  %v1240_v15 = vpop.f32.mrf.mxu0 }
 0x12f   : > { %v1416_v12 = vadd.f32 %v1415_v10, %v1327_v63  ;;  %v1504_v14 = vpop.f32.mrf.mxu3  ;;  %v1329_v18 = vpop.f32.mrf.mxu1  ;;  %v2877_v10 = vld [vmem:[%s4374_s1 + $0xb4] sm:$0xf0] }
 0x130   : > { %v1330_v22 = vadd.f32 %v1329_v18, %v1240_v15  ;;  %v2421_v15 = vor.u32 %v2876_v5, %v2420_v4 }
 0x131   : > { %v3644_v20 = vadd.f32 %v1504_v14, %v1416_v12  ;;  %1555 = vmatmul.bf16.vlgmr.msrb.gmra.mxu0 %v2357_v11  ;;  %v2873_v11 = vld [vmem:[%s4374_s1 + $0x9c] sm:$0xf] }
 0x132   : > { %1644 = vmatmul.bf16.vlgmr.msrb.gmra.mxu1 %v2361_v16  ;;  %v2430_v12 = vld [vmem:[%s4374_s1 + $0xb8] sm:$0xf0] }
 0x133   : > { %1733 = vmatmul.bf16.vlgmr.msrb.gmra.mxu2 %v2365_v17 }
 0x134   : > { %1822 = vmatmul.bf16.vlgmr.msrb.gmra.mxu3 %v2369_v19  ;;  %v2425_v19 = vor.u32 %v2872_v6, %v2422_v7 }
 0x136   : > { %v1418_v23 = vpop.f32.mrf.mxu2  ;;  %v1242_v28 = vpop.f32.mrf.mxu0 }
 0x137   : > { %v1419_v24 = vadd.f32 %v1418_v23, %v1330_v22  ;;  %v1507_v27 = vpop.f32.mrf.mxu3  ;;  %v1331_v29 = vpop.f32.mrf.mxu1  ;;  %v2429_v22 = vor.u32 %v2877_v10, %v2428_v8 }
 0x138   : > { %v1332_v33 = vadd.f32 %v1331_v29, %v1242_v28 }
 0x139   : > { %v3646_v32 = vadd.f32 %v1507_v27, %v1419_v24  ;;  %v2433_v24 = vor.u32 %v2873_v11, %v2430_v12  ;;  %v2484_v12 = vld [vmem:[%s4374_s1 + $0x110] sm:$0xf] }
 0x13e   : > { %v1420_v42 = vpop.f32.mrf.mxu2  ;;  %v1245_v46 = vpop.f32.mrf.mxu0 }
 0x13f   : > { %v1421_v44 = vadd.f32 %v1420_v42, %v1332_v33  ;;  %v1509_v45 = vpop.f32.mrf.mxu3  ;;  %v1334_v51 = vpop.f32.mrf.mxu1  ;;  %v2454_v42 = vld [vmem:[%s4374_s1 + $0xf0] sm:$0xf0] }
 0x140   : > { %v1335_v58 = vadd.f32 %v1334_v51, %v1245_v46  ;;  %v2462_v46 = vld [vmem:[%s4374_s1 + $0xf8] sm:$0xf0] }
 0x141   : > { %v3672_v55 = vadd.f32 %v1509_v45, %v1421_v44  ;;  %1560 = vmatmul.bf16.gmra.mxu0 %v2389_v43  ;;  %v2460_v43 = vld [vmem:[%s4374_s1 + $0xd8] sm:$0xf]  ;;  %v2881_v45 = vld [vmem:[%s4374_s1 + $0xdc] sm:$0xf] }
 0x142   : > { %1649 = vmatmul.bf16.gmra.mxu1 %v2393_v48  ;;  %v2885_v44 = vld [vmem:[%s4374_s1 + $0xf4] sm:$0xf0] }
 0x143   : > { %1738 = vmatmul.bf16.gmra.mxu2 %v2397_v50  ;;  %v2453_v50 = vor.u32 %v2884_v40, %v2452_v39 }
 0x144   : > { %1827 = vmatmul.bf16.gmra.mxu3 %v2401_v53 }
 0x146   : > { %v1423_v59 = vpop.f32.mrf.mxu2  ;;  %v1247_v63 = vpop.f32.mrf.mxu0 }
 0x147   : > { %v1424_v60 = vadd.f32 %v1423_v59, %v1335_v58  ;;  %v1512_v61 = vpop.f32.mrf.mxu3  ;;  %v1336_v1 = vpop.f32.mrf.mxu1  ;;  %v2457_v59 = vor.u32 %v2880_v41, %v2454_v42 }
 0x148   : > { %v1337_v3 = vadd.f32 %v1336_v1, %v1247_v63  ;;  %v2465_v63 = vor.u32 %v2881_v45, %v2462_v46 }
 0x149   : > { %v3674_v2 = vadd.f32 %v1512_v61, %v1424_v60  ;;  %v2461_v60 = vor.u32 %v2885_v44, %v2460_v43 }
 0x14e   : > { %v1425_v14 = vpop.f32.mrf.mxu2  ;;  %v1250_v18 = vpop.f32.mrf.mxu0 }
 0x14f   : > { %v1426_v16 = vadd.f32 %v1425_v14, %v1337_v3  ;;  %v1514_v17 = vpop.f32.mrf.mxu3  ;;  %v1339_v23 = vpop.f32.mrf.mxu1  ;;  %v2892_v14 = vld [vmem:[%s4374_s1 + $0x12c] sm:$0xf0] }
 0x150   : > { %v1340_v28 = vadd.f32 %v1339_v23, %v1250_v18  ;;  %v2893_v18 = vld [vmem:[%s4374_s1 + $0x134] sm:$0xf0] }
 0x151   : > { %v3700_v27 = vadd.f32 %v1514_v17, %v1426_v16  ;;  %1565 = vmatmul.bf16.gmra.mxu0 %v2421_v15  ;;  %v2888_v15 = vld [vmem:[%s4374_s1 + $0x114] sm:$0xf]  ;;  %v2492_v17 = vld [vmem:[%s4374_s1 + $0x118] sm:$0xf] }
 0x152   : > { %1654 = vmatmul.bf16.gmra.mxu1 %v2425_v19  ;;  %v2486_v16 = vld [vmem:[%s4374_s1 + $0x130] sm:$0xf0]  ;;  %v2889_v19 = vld [vmem:[%s4374_s1 + $0x11c] sm:$0xf] }
 0x153   : > { %1743 = vmatmul.bf16.gmra.mxu2 %v2429_v22  ;;  %v2494_v22 = vld [vmem:[%s4374_s1 + $0x138] sm:$0xf0] }
 0x154   : > { %1832 = vmatmul.bf16.gmra.mxu3 %v2433_v24  ;;  %v2485_v24 = vor.u32 %v2892_v14, %v2484_v12 }
 0x156   : > { %v1428_v29 = vpop.f32.mrf.mxu2  ;;  %v1252_v35 = vpop.f32.mrf.mxu0 }
 0x157   : > { %v1429_v33 = vadd.f32 %v1428_v29, %v1340_v28  ;;  %v1517_v34 = vpop.f32.mrf.mxu3  ;;  %v1341_v36 = vpop.f32.mrf.mxu1 }
 0x158   : > { %v1342_v38 = vadd.f32 %v1341_v36, %v1252_v35  ;;  %v2493_v35 = vor.u32 %v2893_v18, %v2492_v17 }
 0x159   : > { %v3702_v37 = vadd.f32 %v1517_v34, %v1429_v33  ;;  %v2489_v34 = vor.u32 %v2888_v15, %v2486_v16 }
 0x15e   : > { %v1430_v48 = vpop.f32.mrf.mxu2  ;;  %v1255_v58 = vpop.f32.mrf.mxu0 }
 0x15f   : > { %v1431_v51 = vadd.f32 %v1430_v48, %v1342_v38  ;;  %v1519_v53 = vpop.f32.mrf.mxu3  ;;  %v1344_v61 = vpop.f32.mrf.mxu1  ;;  %v2497_v38 = vor.u32 %v2889_v19, %v2494_v22 }
 0x160   : > { %v1345_v3 = vadd.f32 %v1344_v61, %v1255_v58  ;;  %v2518_v58 = vld [vmem:[%s4374_s1 + $0x170] sm:$0xf0]  ;;  %v2897_v61 = vld [vmem:[%s4374_s1 + $0x15c] sm:$0xf] }
 0x161   : > { %v3728_v1 = vadd.f32 %v1519_v53, %v1431_v51  ;;  %1570 = vmatmul.bf16.gmra.mxu0 %v2453_v50  ;;  %v2516_v50 = vld [vmem:[%s4374_s1 + $0x150] sm:$0xf]  ;;  %v2896_v53 = vld [vmem:[%s4374_s1 + $0x154] sm:$0xf] }
 0x162   : > { %1659 = vmatmul.bf16.gmra.mxu1 %v2457_v59  ;;  %v2900_v51 = vld [vmem:[%s4374_s1 + $0x16c] sm:$0xf0]  ;;  %v2524_v59 = vld [vmem:[%s4374_s1 + $0x158] sm:$0xf] }
 0x163   : > { %1748 = vmatmul.bf16.gmra.mxu2 %v2461_v60  ;;  %v2901_v60 = vld [vmem:[%s4374_s1 + $0x174] sm:$0xf0] }
 0x164   : > { %1837 = vmatmul.bf16.gmra.mxu3 %v2465_v63  ;;  %v2526_v63 = vld [vmem:[%s4374_s1 + $0x178] sm:$0xf0] }
 0x165   : > { %v2529_v14 = vor.u32 %v2897_v61, %v2526_v63 }
 0x166   : > { %v1433_v4 = vpop.f32.mrf.mxu2  ;;  %v1257_v7 = vpop.f32.mrf.mxu0 }
 0x167   : > { %v1434_v5 = vadd.f32 %v1433_v4, %v1345_v3  ;;  %v1522_v6 = vpop.f32.mrf.mxu3  ;;  %v1346_v8 = vpop.f32.mrf.mxu1  ;;  %v2517_v4 = vor.u32 %v2900_v51, %v2516_v50 }
 0x168   : > { %v1347_v11 = vadd.f32 %v1346_v8, %v1257_v7  ;;  %v2521_v8 = vor.u32 %v2896_v53, %v2518_v58 }
 0x169   : > { %v3730_v10 = vadd.f32 %v1522_v6, %v1434_v5 }
 0x16e   : > { %v1435_v23 = vpop.f32.mrf.mxu2  ;;  %v1260_v33 = vpop.f32.mrf.mxu0 }
 0x16f   : > { %v1436_v28 = vadd.f32 %v1435_v23, %v1347_v11  ;;  %v1524_v29 = vpop.f32.mrf.mxu3  ;;  %v1349_v36 = vpop.f32.mrf.mxu1  ;;  %v2525_v11 = vor.u32 %v2901_v60, %v2524_v59 }
 0x170   : > { %v1350_v40 = vadd.f32 %v1349_v36, %v1260_v33  ;;  %v2908_v33 = vld [vmem:[%s4374_s1 + $0x1ac] sm:$0xf0]  ;;  %v2556_v36 = vld [vmem:[%s4374_s1 + $0x198] sm:$0xf] }
 0x171   : > { %v3756_v39 = vadd.f32 %v1524_v29, %v1436_v28  ;;  %1575 = vmatmul.bf16.gmra.mxu0 %v2485_v24  ;;  %v2548_v29 = vld [vmem:[%s4374_s1 + $0x190] sm:$0xf] }
 0x172   : > { %1664 = vmatmul.bf16.gmra.mxu1 %v2489_v34  ;;  %v2904_v34 = vld [vmem:[%s4374_s1 + $0x194] sm:$0xf] }
 0x173   : > { %1753 = vmatmul.bf16.gmra.mxu2 %v2493_v35  ;;  %v2550_v35 = vld [vmem:[%s4374_s1 + $0x1b0] sm:$0xf0] }
 0x174   : > { %1842 = vmatmul.bf16.gmra.mxu3 %v2497_v38  ;;  %v2909_v38 = vld [vmem:[%s4374_s1 + $0x1b4] sm:$0xf0]  ;;  %v2553_v50 = vor.u32 %v2904_v34, %v2550_v35 }
 0x175   : > { %v2557_v51 = vor.u32 %v2909_v38, %v2556_v36 }
 0x176   : > { %v1438_v41 = vpop.f32.mrf.mxu2  ;;  %v1262_v44 = vpop.f32.mrf.mxu0 }
 0x177   : > { %v1439_v42 = vadd.f32 %v1438_v41, %v1350_v40  ;;  %v1527_v43 = vpop.f32.mrf.mxu3  ;;  %v1351_v45 = vpop.f32.mrf.mxu1  ;;  %v2905_v40 = vld [vmem:[%s4374_s1 + $0x19c] sm:$0xf] }
 0x178   : > { %v1352_v48 = vadd.f32 %v1351_v45, %v1262_v44  ;;  %v2558_v41 = vld [vmem:[%s4374_s1 + $0x1b8] sm:$0xf0] }
 0x179   : > { %v3758_v46 = vadd.f32 %v1527_v43, %v1439_v42  ;;  %v2549_v43 = vor.u32 %v2908_v33, %v2548_v29  ;;  %v2561_v58 = vor.u32 %v2905_v40, %v2558_v41 }
 0x17e   : > { %v1440_v3 = vpop.f32.mrf.mxu2  ;;  %v1265_v7 = vpop.f32.mrf.mxu0 }
 0x17f   : > { %v1441_v5 = vadd.f32 %v1440_v3, %v1352_v48  ;;  %v1529_v6 = vpop.f32.mrf.mxu3  ;;  %v1354_v12 = vpop.f32.mrf.mxu1 }
 0x180   : > { %v1355_v16 = vadd.f32 %v1354_v12, %v1265_v7  ;;  %v2912_v12 = vld [vmem:[%s4374_s1 + $0x1d4] sm:$0xf] }
 0x181   : > { %v3784_v15 = vadd.f32 %v1529_v6, %v1441_v5  ;;  %1580 = vmatmul.bf16.gmra.mxu0 %v2517_v4 }
 0x182   : > { %1669 = vmatmul.bf16.gmra.mxu1 %v2521_v8  ;;  %v2580_v8 = vld [vmem:[%s4374_s1 + $0x1d0] sm:$0xf] }
 0x183   : > { %1758 = vmatmul.bf16.gmra.mxu2 %v2525_v11  ;;  %v2916_v11 = vld [vmem:[%s4374_s1 + $0x1ec] sm:$0xf0] }
 0x184   : > { %1847 = vmatmul.bf16.gmra.mxu3 %v2529_v14  ;;  %v2582_v14 = vld [vmem:[%s4374_s1 + $0x1f0] sm:$0xf0] }
 0x185   : > { %v2585_v34 = vor.u32 %v2912_v12, %v2582_v14 }
 0x186   : > { %v1443_v17 = vpop.f32.mrf.mxu2  ;;  %v1267_v22 = vpop.f32.mrf.mxu0 }
 0x187   : > { %v1444_v18 = vadd.f32 %v1443_v17, %v1355_v16  ;;  %v1532_v19 = vpop.f32.mrf.mxu3  ;;  %v1356_v23 = vpop.f32.mrf.mxu1  ;;  %v2588_v16 = vld [vmem:[%s4374_s1 + $0x1d8] sm:$0xf] }
 0x188   : > { %v1357_v28 = vadd.f32 %v1356_v23, %v1267_v22  ;;  %v2917_v17 = vld [vmem:[%s4374_s1 + $0x1f4] sm:$0xf0]  ;;  %v2581_v23 = vor.u32 %v2916_v11, %v2580_v8 }
 0x189   : > { %v3786_v24 = vadd.f32 %v1532_v19, %v1444_v18  ;;  %v2913_v18 = vld [vmem:[%s4374_s1 + $0x1dc] sm:$0xf]  ;;  %v2589_v35 = vor.u32 %v2917_v17, %v2588_v16 }
 0x18a   : > { %v2590_v19 = vld [vmem:[%s4374_s1 + $0x1f8] sm:$0xf0] }
 0x18b   : > { %v2593_v38 = vor.u32 %v2913_v18, %v2590_v19 }
 0x18e   : > { %v1445_v42 = vpop.f32.mrf.mxu2  ;;  %v1270_v48 = vpop.f32.mrf.mxu0 }
 0x18f   : > { %v1446_v44 = vadd.f32 %v1445_v42, %v1357_v28  ;;  %v1534_v45 = vpop.f32.mrf.mxu3  ;;  %v1359_v53 = vpop.f32.mrf.mxu1 }
 0x190   : > { %v1360_v60 = vadd.f32 %v1359_v53, %v1270_v48  ;;  %v2612_v53 = vld [vmem:[%s4374_s1 + $0x210] sm:$0xf] }
 0x191   : > { %v3812_v59 = vadd.f32 %v1534_v45, %v1446_v44  ;;  %1585 = vmatmul.bf16.gmra.mxu0 %v2549_v43 }
 0x192   : > { %1674 = vmatmul.bf16.gmra.mxu1 %v2553_v50 }
 0x193   : > { %1763 = vmatmul.bf16.gmra.mxu2 %v2557_v51 }
 0x194   : > { %1852 = vmatmul.bf16.gmra.mxu3 %v2561_v58  ;;  %v2924_v58 = vld [vmem:[%s4374_s1 + $0x22c] sm:$0xf0] }
 0x195   : > { %v2613_v8 = vor.u32 %v2924_v58, %v2612_v53  ;;  %v2929_v53 = vld [vmem:[%s4374_s1 + $0x25c] sm:$0xf] }
 0x196   : > { %v1448_v61 = vpop.f32.mrf.mxu2  ;;  %v1272_v4 = vpop.f32.mrf.mxu0  ;;  %v2654_v58 = vld [vmem:[%s4374_s1 + $0x278] sm:$0xf0] }
 0x197   : > { %v1449_v63 = vadd.f32 %v1448_v61, %v1360_v60  ;;  %v1537_v3 = vpop.f32.mrf.mxu3  ;;  %v1361_v5 = vpop.f32.mrf.mxu1  ;;  %v2920_v60 = vld [vmem:[%s4374_s1 + $0x214] sm:$0xf] }
 0x198   : > { %v1362_v7 = vadd.f32 %v1361_v5, %v1272_v4  ;;  %v2614_v61 = vld [vmem:[%s4374_s1 + $0x230] sm:$0xf0]  ;;  %v2921_v4 = vld [vmem:[%s4374_s1 + $0x21c] sm:$0xf] }
 0x199   : > { %v3814_v6 = vadd.f32 %v1537_v3, %v1449_v63  ;;  %v2620_v63 = vld [vmem:[%s4374_s1 + $0x218] sm:$0xf]  ;;  %v2622_v5 = vld [vmem:[%s4374_s1 + $0x238] sm:$0xf0]  ;;  %v2617_v16 = vor.u32 %v2920_v60, %v2614_v61 }
 0x19a   : > { %v2925_v3 = vld [vmem:[%s4374_s1 + $0x234] sm:$0xf0]  ;;  %v2625_v19 = vor.u32 %v2921_v4, %v2622_v5 }
 0x19b   : > { %v2621_v17 = vor.u32 %v2925_v3, %v2620_v63 }
 0x19e   : > { %v1450_v22 = vpop.f32.mrf.mxu2  ;;  %v1275_v33 = vpop.f32.mrf.mxu0 }
 0x19f   : > { %v1451_v28 = vadd.f32 %v1450_v22, %v1362_v7  ;;  %v1539_v29 = vpop.f32.mrf.mxu3  ;;  %v1364_v36 = vpop.f32.mrf.mxu1 }
 0x1a0   : > { %v1365_v41 = vadd.f32 %v1364_v36, %v1275_v33 }
 0x1a1   : > { %v3840_v40 = vadd.f32 %v1539_v29, %v1451_v28  ;;  %1590 = vmatmul.bf16.gmra.mxu0 %v2581_v23 }
 0x1a2   : > { %1679 = vmatmul.bf16.gmra.mxu1 %v2585_v34 }
 0x1a3   : > { %1768 = vmatmul.bf16.gmra.mxu2 %v2589_v35 }
 0x1a4   : > { %1857 = vmatmul.bf16.gmra.mxu3 %v2593_v38 }
 0x1a6   : > { %v1453_v42 = vpop.f32.mrf.mxu2  ;;  %v1277_v45 = vpop.f32.mrf.mxu0 }
 0x1a7   : > { %v1454_v43 = vadd.f32 %v1453_v42, %v1365_v41  ;;  %v1542_v44 = vpop.f32.mrf.mxu3  ;;  %v1366_v48 = vpop.f32.mrf.mxu1  ;;  %v2644_v42 = vld [vmem:[%s4374_s1 + $0x250] sm:$0xf] }
 0x1a8   : > { %v1367_v51 = vadd.f32 %v1366_v48, %v1277_v45  ;;  %v2646_v45 = vld [vmem:[%s4374_s1 + $0x270] sm:$0xf0]  ;;  %v2933_v48 = vld [vmem:[%s4374_s1 + $0x274] sm:$0xf0] }
 0x1a9   : > { %v3842_v50 = vadd.f32 %v1542_v44, %v1454_v43  ;;  %v2932_v43 = vld [vmem:[%s4374_s1 + $0x26c] sm:$0xf0]  ;;  %v2928_v44 = vld [vmem:[%s4374_s1 + $0x254] sm:$0xf] }
 0x1aa   : > { %v2645_v61 = vor.u32 %v2932_v43, %v2644_v42  ;;  %v2649_v5 = vor.u32 %v2928_v44, %v2646_v45  ;;  %v2941_v42 = vld [vmem:[%s4374_s1 + $0x2b4] sm:$0xf0]  ;;  %v2937_v43 = vld [vmem:[%s4374_s1 + $0x29c] sm:$0xf] }
 0x1ab   : > { %v2686_v44 = vld [vmem:[%s4374_s1 + $0x2b8] sm:$0xf0] }
 0x1ae   : > { %v1455_v7 = vpop.f32.mrf.mxu2  ;;  %v1556_v14 = vpop.f32.mrf.mxu0 }
 0x1af   : > { %v1456_v11 = vadd.f32 %v1455_v7, %v1367_v51  ;;  %v1544_v12 = vpop.f32.mrf.mxu3  ;;  %v1645_v18 = vpop.f32.mrf.mxu1  ;;  %v1557_v23 = vadd.f32 %v1556_v14, %v3404_v25 }
 0x1b1   : > { %v3868_v22 = vadd.f32 %v1544_v12, %v1456_v11  ;;  %1595 = vmatmul.bf16.gmra.mxu0 %v2613_v8  ;;  %v1646_v28 = vadd.f32 %v1645_v18, %v1557_v23  ;;  %v2657_v11 = vor.u32 %v2929_v53, %v2654_v58 }
 0x1b2   : > { %1684 = vmatmul.bf16.gmra.mxu1 %v2617_v16 }
 0x1b3   : > { %1773 = vmatmul.bf16.gmra.mxu2 %v2621_v17 }
 0x1b4   : > { %1862 = vmatmul.bf16.gmra.mxu3 %v2625_v19 }
 0x1b6   : > { %v1734_v29 = vpop.f32.mrf.mxu2  ;;  %v1558_v35 = vpop.f32.mrf.mxu0 }
 0x1b7   : > { %v1735_v33 = vadd.f32 %v1734_v29, %v1646_v28  ;;  %v1823_v34 = vpop.f32.mrf.mxu3  ;;  %v1647_v36 = vpop.f32.mrf.mxu1  ;;  %v1559_v41 = vadd.f32 %v1558_v35, %v3432_v47  ;;  %v2652_v47 = vld [vmem:[%s4374_s1 + $0x258] sm:$0xf] }
 0x1b8   : > { %v2653_v7 = vor.u32 %v2933_v48, %v2652_v47 }
 0x1b9   : > { %v1824_v38 = vadd.f32 %v1823_v34, %v1735_v33  ;;  %v1648_v51 = vadd.f32 %v1647_v36, %v1559_v41  ;;  %v2940_v36 = vld [vmem:[%s4374_s1 + $0x2ac] sm:$0xf0]  ;;  %v2678_v41 = vld [vmem:[%s4374_s1 + $0x2b0] sm:$0xf0] }
 0x1bb   : > { %v1936_v25 = vsel %vm1935_vm0, %v1824_v38, -inf  ;;  %v2936_v38 = vld [vmem:[%s4374_s1 + $0x294] sm:$0xf] }
 0x1bc   : > { %1937 = vmax.xlane.f32.xlu0 %v1936_v25  ;;  %v2681_v58 = vor.u32 %v2936_v38, %v2678_v41 }
 0x1be   : > { %v1736_v60 = vpop.f32.mrf.mxu2  ;;  %v1561_v4 = vpop.f32.mrf.mxu0 }
 0x1bf   : > { %v1737_v63 = vadd.f32 %v1736_v60, %v1648_v51  ;;  %v1825_v3 = vpop.f32.mrf.mxu3  ;;  %v1650_v8 = vpop.f32.mrf.mxu1  ;;  %v1562_v14 = vadd.f32 %v1561_v4, %v3434_v54  ;;  %v2676_v54 = vld [vmem:[%s4374_s1 + $0x290] sm:$0xf] }
 0x1c0   : > { %v2677_v47 = vor.u32 %v2940_v36, %v2676_v54  ;;  %v2945_v54 = vld [vmem:[%s4374_s1 + $0x2dc] sm:$0xf] }
 0x1c1   : > { %v1826_v12 = vadd.f32 %v1825_v3, %v1737_v63  ;;  %1600 = vmatmul.bf16.gmra.mxu0 %v2645_v61  ;;  %v1651_v17 = vadd.f32 %v1650_v8, %v1562_v14  ;;  %v2689_v63 = vor.u32 %v2937_v43, %v2686_v44 }
 0x1c2   : > { %1689 = vmatmul.bf16.gmra.mxu1 %v2649_v5 }
 0x1c3   : > { %1778 = vmatmul.bf16.gmra.mxu2 %v2653_v7  ;;  %v1939_v16 = vsel %vm1935_vm0, %v1826_v12, -inf }
 0x1c4   : > { %1867 = vmatmul.bf16.gmra.mxu3 %v2657_v11  ;;  %1940 = vmax.xlane.f32.xlu0 %v1939_v16 }
 0x1c6   : > { %v1739_v18 = vpop.f32.mrf.mxu2  ;;  %v1563_v28 = vpop.f32.mrf.mxu0 }
 0x1c7   : > { %v1740_v19 = vadd.f32 %v1739_v18, %v1651_v17  ;;  %v1828_v23 = vpop.f32.mrf.mxu3  ;;  %v1652_v29 = vpop.f32.mrf.mxu1  ;;  %v1564_v34 = vadd.f32 %v1563_v28, %v3460_v9  ;;  %v2684_v9 = vld [vmem:[%s4374_s1 + $0x298] sm:$0xf]  ;;  %v2944_v28 = vld [vmem:[%s4374_s1 + $0x2d4] sm:$0xf] }
 0x1c8   : > { %v2685_v60 = vor.u32 %v2941_v42, %v2684_v9 }
 0x1c9   : > { %v1829_v33 = vadd.f32 %v1828_v23, %v1740_v19  ;;  %v1653_v25 = vadd.f32 %v1652_v29, %v1564_v34  ;;  %v2948_v23 = vld [vmem:[%s4374_s1 + $0x2ec] sm:$0xf0]  ;;  %v2710_v29 = vld [vmem:[%s4374_s1 + $0x2f0] sm:$0xf0] }
 0x1cb   : > { %v1942_v35 = vsel %vm1935_vm0, %v1829_v33, -inf  ;;  %v2949_v33 = vld [vmem:[%s4374_s1 + $0x2f4] sm:$0xf0] }
 0x1cc   : > { %1943 = vmax.xlane.f32.xlu1 %v1942_v35  ;;  %v2718_v35 = vld [vmem:[%s4374_s1 + $0x2f8] sm:$0xf0] }
 0x1ce   : > { %v1741_v45 = vpop.f32.mrf.mxu2  ;;  %v1566_v53 = vpop.f32.mrf.mxu0 }
 0x1cf   : > { %v1742_v48 = vadd.f32 %v1741_v45, %v1653_v25  ;;  %v1830_v51 = vpop.f32.mrf.mxu3  ;;  %v1655_v61 = vpop.f32.mrf.mxu1  ;;  %v1567_v4 = vadd.f32 %v1566_v53, %v3468_v26  ;;  %v2708_v26 = vld [vmem:[%s4374_s1 + $0x2d0] sm:$0xf]  ;;  %v2713_v25 = vor.u32 %v2944_v28, %v2710_v29  ;;  %v2721_v45 = vor.u32 %v2945_v54, %v2718_v35 }
 0x1d0   : > { %v2709_v38 = vor.u32 %v2948_v23, %v2708_v26 }
 0x1d1   : > { %v1831_v3 = vadd.f32 %v1830_v51, %v1742_v48  ;;  %1605 = vmatmul.bf16.gmra.mxu0 %v2677_v47  ;;  %v1656_v7 = vadd.f32 %v1655_v61, %v1567_v4 }
 0x1d2   : > { %1694 = vmatmul.bf16.gmra.mxu1 %v2681_v58 }
 0x1d3   : > { %1783 = vmatmul.bf16.gmra.mxu2 %v2685_v60  ;;  %v1945_v5 = vsel %vm1935_vm0, %v1831_v3, -inf }
 0x1d4   : > { %1872 = vmatmul.bf16.gmra.mxu3 %v2689_v63  ;;  %1946 = vmax.xlane.f32.xlu1 %v1945_v5 }
 0x1d6   : > { %v1744_v8 = vpop.f32.mrf.mxu2  ;;  %v1568_v14 = vpop.f32.mrf.mxu0 }
 0x1d7   : > { %v1745_v11 = vadd.f32 %v1744_v8, %v1656_v7  ;;  %v1833_v12 = vpop.f32.mrf.mxu3  ;;  %v1657_v16 = vpop.f32.mrf.mxu1  ;;  %v1569_v18 = vadd.f32 %v1568_v14, %v3496_v49  ;;  %v2716_v49 = vld [vmem:[%s4374_s1 + $0x2d8] sm:$0xf]  ;;  %v2956_v8 = vld [vmem:[%s4374_s1 + $0x32c] sm:$0xf0] }
 0x1d8   : > { %v2717_v43 = vor.u32 %v2949_v33, %v2716_v49  ;;  %v2957_v14 = vld [vmem:[%s4374_s1 + $0x334] sm:$0xf0] }
 0x1d9   : > { %v1834_v17 = vadd.f32 %v1833_v12, %v1745_v11  ;;  %v1658_v34 = vadd.f32 %v1657_v16, %v1569_v18  ;;  %v2952_v11 = vld [vmem:[%s4374_s1 + $0x314] sm:$0xf]  ;;  %v2750_v18 = vld [vmem:[%s4374_s1 + $0x338] sm:$0xf0] }
 0x1da   : > { %v2742_v12 = vld [vmem:[%s4374_s1 + $0x330] sm:$0xf0] }
 0x1db   : > { %v1948_v19 = vsel %vm1935_vm0, %v1834_v17, -inf  ;;  %v2953_v17 = vld [vmem:[%s4374_s1 + $0x31c] sm:$0xf]  ;;  %v2745_v49 = vor.u32 %v2952_v11, %v2742_v12 }
 0x1dc   : > { %1949 = vmax.xlane.f32.xlu2 %v1948_v19  ;;  %v2753_v54 = vor.u32 %v2953_v17, %v2750_v18 }
 0x1de   : > { %v1746_v36 = vpop.f32.mrf.mxu2  ;;  %v1571_v42 = vpop.f32.mrf.mxu0 }
 0x1df   : > { %v1747_v41 = vadd.f32 %v1746_v36, %v1658_v34  ;;  %v1835_v9 = vpop.f32.mrf.mxu3  ;;  %v1660_v44 = vpop.f32.mrf.mxu1  ;;  %v1572_v48 = vadd.f32 %v1571_v42, %v3498_v57  ;;  %v2740_v57 = vld [vmem:[%s4374_s1 + $0x310] sm:$0xf] }
 0x1e0   : > { %v2741_v19 = vor.u32 %v2956_v8, %v2740_v57 }
 0x1e1   : > { %v1836_v47 = vadd.f32 %v1835_v9, %v1747_v41  ;;  %1610 = vmatmul.bf16.gmra.mxu0 %v2709_v38  ;;  %v1661_v53 = vadd.f32 %v1660_v44, %v1572_v48 }
 0x1e2   : > { %1699 = vmatmul.bf16.gmra.mxu1 %v2713_v25 }
 0x1e3   : > { %1788 = vmatmul.bf16.gmra.mxu2 %v2717_v43  ;;  %v1951_v51 = vsel %vm1935_vm0, %v1836_v47, -inf }
 0x1e4   : > { %1877 = vmatmul.bf16.gmra.mxu3 %v2721_v45  ;;  %1952 = vmax.xlane.f32.xlu2 %v1951_v51  ;;  %v2964_v51 = vld [vmem:[%s4374_s1 + $0x36c] sm:$0xf0] }
 0x1e6   : > { %v1749_v58 = vpop.f32.mrf.mxu2  ;;  %v1573_v63 = vpop.f32.mrf.mxu0 }
 0x1e7   : > { %v1750_v60 = vadd.f32 %v1749_v58, %v1661_v53  ;;  %v1838_v61 = vpop.f32.mrf.mxu3  ;;  %v1662_v3 = vpop.f32.mrf.mxu1  ;;  %v1574_v5 = vadd.f32 %v1573_v63, %v3524_v13  ;;  %v2748_v13 = vld [vmem:[%s4374_s1 + $0x318] sm:$0xf]  ;;  %v2960_v53 = vld [vmem:[%s4374_s1 + $0x354] sm:$0xf]  ;;  %v2961_v63 = vld [vmem:[%s4374_s1 + $0x35c] sm:$0xf] }
 0x1e8   : > { %v2749_v33 = vor.u32 %v2957_v14, %v2748_v13  ;;  %v2774_v58 = vld [vmem:[%s4374_s1 + $0x370] sm:$0xf0] }
 0x1e9   : > { %v1839_v4 = vadd.f32 %v1838_v61, %v1750_v60  ;;  %v1663_v16 = vadd.f32 %v1662_v3, %v1574_v5  ;;  %v2965_v60 = vld [vmem:[%s4374_s1 + $0x374] sm:$0xf0]  ;;  %v2782_v3 = vld [vmem:[%s4374_s1 + $0x378] sm:$0xf0]  ;;  %v2777_v11 = vor.u32 %v2960_v53, %v2774_v58 }
 0x1ea   : > { %v2785_v14 = vor.u32 %v2961_v63, %v2782_v3 }
 0x1eb   : > { %v1954_v7 = vsel %vm1935_vm0, %v1839_v4, -inf }
 0x1ec   : > { %1955 = vmax.xlane.f32.xlu0 %v1954_v7 }
 0x1ee   : > { %v1751_v26 = vpop.f32.mrf.mxu2  ;;  %v1576_v29 = vpop.f32.mrf.mxu0 }
 0x1ef   : > { %v1752_v23 = vadd.f32 %v1751_v26, %v1663_v16  ;;  %v1840_v28 = vpop.f32.mrf.mxu3  ;;  %v1665_v34 = vpop.f32.mrf.mxu1  ;;  %v1577_v36 = vadd.f32 %v1576_v29, %v3532_v31  ;;  %v2772_v31 = vld [vmem:[%s4374_s1 + $0x350] sm:$0xf] }
 0x1f0   : > { %v2773_v5 = vor.u32 %v2964_v51, %v2772_v31 }
 0x1f1   : > { %v1841_v35 = vadd.f32 %v1840_v28, %v1752_v23  ;;  %1615 = vmatmul.bf16.gmra.mxu0 %v2741_v19  ;;  %v1666_v41 = vadd.f32 %v1665_v34, %v1577_v36 }
 0x1f2   : > { %1704 = vmatmul.bf16.gmra.mxu1 %v2745_v49 }
 0x1f3   : > { %1793 = vmatmul.bf16.gmra.mxu2 %v2749_v33  ;;  %v1957_v38 = vsel %vm1935_vm0, %v1841_v35, -inf  ;;  %v2972_v35 = vld [vmem:[%s4374_s1 + $0x3ac] sm:$0xf0] }
 0x1f4   : > { %1882 = vmatmul.bf16.gmra.mxu3 %v2753_v54  ;;  %1958 = vmax.xlane.f32.xlu1 %v1957_v38  ;;  %v3031_v54 = vmov -inf   ;;  %v2806_v38 = vld [vmem:[%s4374_s1 + $0x3b0] sm:$0xf0] }
 0x1f5   : > { %199 = vst.msk [vmem:[#allocation2] sm:$0xff] %vm198_vm1, %v3031_v54 }
 0x1f6   : > { %v1754_v9 = vpop.f32.mrf.mxu2  ;;  %v1578_v43 = vpop.f32.mrf.mxu0  ;;  %200 = vst.msk [vmem:[#allocation2 + $0x8] sm:$0xff] %vm198_vm1, %v3031_v54 }
 0x1f7   : > { %v1755_v42 = vadd.f32 %v1754_v9, %v1666_v41  ;;  %v1843_v25 = vpop.f32.mrf.mxu3  ;;  %v1667_v44 = vpop.f32.mrf.mxu1  ;;  %v1579_v47 = vadd.f32 %v1578_v43, %v3560_v56  ;;  %v2780_v56 = vld [vmem:[%s4374_s1 + $0x358] sm:$0xf]  ;;  %201 = vst.msk [vmem:[#allocation2 + $0x10] sm:$0xff] %vm198_vm1, %v3031_v54  ;;  %v2814_v43 = vld [vmem:[%s4374_s1 + $0x3b8] sm:$0xf0] }
 0x1f8   : > { %v2781_v12 = vor.u32 %v2965_v60, %v2780_v56  ;;  %v2812_v41 = vld [vmem:[%s4374_s1 + $0x398] sm:$0xf]  ;;  %202 = vst.msk [vmem:[#allocation2 + $0x18] sm:$0xff] %vm198_vm1, %v3031_v54 }
 0x1f9   : > { %v1844_v45 = vadd.f32 %v1843_v25, %v1755_v42  ;;  %v1668_v61 = vadd.f32 %v1667_v44, %v1579_v47  ;;  %v2973_v9 = vld [vmem:[%s4374_s1 + $0x3b4] sm:$0xf0]  ;;  %v2969_v25 = vld [vmem:[%s4374_s1 + $0x39c] sm:$0xf]  ;;  %203 = vst.msk [vmem:[#allocation2 + $0x20] sm:$0xff] %vm198_vm1, %v3031_v54 }
 0x1fa   : > { %204 = vst.msk [vmem:[#allocation2 + $0x28] sm:$0xff] %vm198_vm1, %v3031_v54  ;;  %v2813_v53 = vor.u32 %v2973_v9, %v2812_v41  ;;  %v2817_v56 = vor.u32 %v2969_v25, %v2814_v43 }
 0x1fb   : > { %v1960_v48 = vsel %vm1935_vm0, %v1844_v45, -inf  ;;  %205 = vst.msk [vmem:[#allocation2 + $0x30] sm:$0xff] %vm198_vm1, %v3031_v54 }
 0x1fc   : > { %1961 = vmax.xlane.f32.xlu2 %v1960_v48  ;;  %206 = vst.msk [vmem:[#allocation2 + $0x38] sm:$0xff] %vm198_vm1, %v3031_v54 }
 0x1fd   : > { %207 = vst.msk [vmem:[#allocation2 + $0x40] sm:$0xff] %vm198_vm1, %v3031_v54 }
 0x1fe   : > { %v1756_v4 = vpop.f32.mrf.mxu2  ;;  %v1581_v8 = vpop.f32.mrf.mxu0  ;;  %208 = vst.msk [vmem:[#allocation2 + $0x48] sm:$0xff] %vm198_vm1, %v3031_v54 }
 0x1ff   : > { %v1757_v57 = vadd.f32 %v1756_v4, %v1668_v61  ;;  %v1845_v7 = vpop.f32.mrf.mxu3  ;;  %v1670_v13 = vpop.f32.mrf.mxu1  ;;  %v1582_v17 = vadd.f32 %v1581_v8, %v3562_v0  ;;  %v2804_v0 = vld [vmem:[%s4374_s1 + $0x390] sm:$0xf]  ;;  %209 = vst.msk [vmem:[#allocation2 + $0x50] sm:$0xff] %vm198_vm1, %v3031_v54 }
 0x200   : > { %v2805_v45 = vor.u32 %v2972_v35, %v2804_v0  ;;  %210 = vst.msk [vmem:[#allocation2 + $0x58] sm:$0xff] %vm198_vm1, %v3031_v54 }
 0x201   : > { %v1846_v16 = vadd.f32 %v1845_v7, %v1757_v57  ;;  %1620 = vmatmul.bf16.gmra.mxu0 %v2773_v5  ;;  %v1671_v26 = vadd.f32 %v1670_v13, %v1582_v17  ;;  %211 = vst.msk [vmem:[#allocation2 + $0x60] sm:$0xff] %vm198_vm1, %v3031_v54  ;;  %v2980_v13 = vld [vmem:[%s4374_s1 + $0x3ec] sm:$0xf0]  ;;  %v2844_v17 = vld [vmem:[%s4374_s1 + $0x3d8] sm:$0xf] }
 0x202   : > { %1709 = vmatmul.bf16.gmra.mxu1 %v2777_v11  ;;  %212 = vst.msk [vmem:[#allocation2 + $0x68] sm:$0xff] %vm198_vm1, %v3031_v54 }
 0x203   : > { %1798 = vmatmul.bf16.gmra.mxu2 %v2781_v12  ;;  %v1963_v18 = vsel %vm1935_vm0, %v1846_v16, -inf  ;;  %213 = vst.msk [vmem:[#allocation2 + $0x70] sm:$0xff] %vm198_vm1, %v3031_v54  ;;  %v2836_v12 = vld [vmem:[%s4374_s1 + $0x3d0] sm:$0xf]  ;;  %v2838_v16 = vld [vmem:[%s4374_s1 + $0x3f0] sm:$0xf0] }
 0x204   : > { %1887 = vmatmul.bf16.gmra.mxu3 %v2785_v14  ;;  %1964 = vmax.xlane.f32.xlu0 %v1963_v18  ;;  %214 = vst.msk [vmem:[#allocation2 + $0x78] sm:$0xff] %vm198_vm1, %v3031_v54  ;;  %v2981_v18 = vld [vmem:[%s4374_s1 + $0x3f4] sm:$0xf0] }
 0x205   : > { %215 = vst.msk [vmem:[#allocation2 + $0x80] sm:$0xff] %vm198_vm1, %v3031_v54  ;;  %v2845_v35 = vor.u32 %v2981_v18, %v2844_v17 }
 0x206   : > { %v1759_v19 = vpop.f32.mrf.mxu2  ;;  %v1583_v29 = vpop.f32.mrf.mxu0  ;;  %216 = vst.msk [vmem:[#allocation2 + $0x88] sm:$0xff] %vm198_vm1, %v3031_v54 }
 0x207   : > { %v1760_v23 = vadd.f32 %v1759_v19, %v1671_v26  ;;  %v1848_v28 = vpop.f32.mrf.mxu3  ;;  %v1672_v49 = vpop.f32.mrf.mxu1  ;;  %v1584_v34 = vadd.f32 %v1583_v29, %v3588_v21  ;;  %v2968_v21 = vld [vmem:[%s4374_s1 + $0x394] sm:$0xf]  ;;  %217 = vst.msk [vmem:[#allocation2 + $0x90] sm:$0xff] %vm198_vm1, %v3031_v54  ;;  %v2977_v19 = vld [vmem:[%s4374_s1 + $0x3dc] sm:$0xf]  ;;  %v2837_v29 = vor.u32 %v2980_v13, %v2836_v12 }
 0x208   : > { %v2809_v51 = vor.u32 %v2968_v21, %v2806_v38  ;;  %218 = vst.msk [vmem:[#allocation2 + $0x98] sm:$0xff] %vm198_vm1, %v3031_v54 }
 0x209   : > { %v1849_v33 = vadd.f32 %v1848_v28, %v1760_v23  ;;  %v1673_v42 = vadd.f32 %v1672_v49, %v1584_v34  ;;  %v2846_v23 = vld [vmem:[%s4374_s1 + $0x3f8] sm:$0xf0]  ;;  %219 = vst.msk [vmem:[#allocation2 + $0xa0] sm:$0xff] %vm198_vm1, %v3031_v54 }
 0x20a   : > { %220 = vst.msk [vmem:[#allocation2 + $0xa8] sm:$0xff] %vm198_vm1, %v3031_v54  ;;  %v2849_v21 = vor.u32 %v2977_v19, %v2846_v23 }
 0x20b   : > { %v1966_v36 = vsel %vm1935_vm0, %v1849_v33, -inf  ;;  %221 = vst.msk [vmem:[#allocation2 + $0xb0] sm:$0xff] %vm198_vm1, %v3031_v54 }
 0x20c   : > { %1967 = vmax.xlane.f32.xlu1 %v1966_v36  ;;  %222 = vst.msk [vmem:[#allocation2 + $0xb8] sm:$0xff] %vm198_vm1, %v3031_v54 }
 0x20d   : > { %223 = vst.msk [vmem:[#allocation2 + $0xc0] sm:$0xff] %vm198_vm1, %v3031_v54 }
 0x20e   : > { %v1761_v44 = vpop.f32.mrf.mxu2  ;;  %v1586_v48 = vpop.f32.mrf.mxu0  ;;  %224 = vst.msk [vmem:[#allocation2 + $0xc8] sm:$0xff] %vm198_vm1, %v3031_v54 }
 0x20f   : > { %v1762_v47 = vadd.f32 %v1761_v44, %v1673_v42  ;;  %v1850_v31 = vpop.f32.mrf.mxu3  ;;  %v1675_v58 = vpop.f32.mrf.mxu1  ;;  %v1587_v61 = vadd.f32 %v1586_v48, %v3590_v30  ;;  %225 = vst.msk [vmem:[#allocation2 + $0xd0] sm:$0xff] %vm198_vm1, %v3031_v54 }
 0x210   : > { %226 = vst.msk [vmem:[#allocation2 + $0xd8] sm:$0xff] %vm198_vm1, %v3031_v54 }
 0x211   : > { %v1851_v60 = vadd.f32 %v1850_v31, %v1762_v47  ;;  %1625 = vmatmul.bf16.gmra.mxu0 %v2805_v45  ;;  %v1676_v30 = vadd.f32 %v1675_v58, %v1587_v61  ;;  %227 = vst.msk [vmem:[#allocation2 + $0xe0] sm:$0xff] %vm198_vm1, %v3031_v54 }
 0x212   : > { %1714 = vmatmul.bf16.gmra.mxu1 %v2809_v51  ;;  %228 = vst.msk [vmem:[#allocation2 + $0xe8] sm:$0xff] %vm198_vm1, %v3031_v54 }
 0x213   : > { %1803 = vmatmul.bf16.gmra.mxu2 %v2813_v53  ;;  %v1969_v63 = vsel %vm1935_vm0, %v1851_v60, -inf  ;;  %229 = vst.msk [vmem:[#allocation2 + $0xf0] sm:$0xff] %vm198_vm1, %v3031_v54  ;;  %v1903_v53 = vld [vmem:[#allocation2] sm:$0xff] }
 0x214   : > { %1892 = vmatmul.bf16.gmra.mxu3 %v2817_v56  ;;  %1970 = vmax.xlane.f32.xlu2 %v1969_v63  ;;  %230 = vst.msk [vmem:[#allocation2 + $0xf8] sm:$0xff] %vm198_vm1, %v3031_v54 }
 0x216   : > { %v1764_v3 = vpop.f32.mrf.mxu2  ;;  %v1588_v57 = vpop.f32.mrf.mxu0 }
 0x217   : > { %v1765_v4 = vadd.f32 %v1764_v3, %v1676_v30  ;;  %v1853_v5 = vpop.f32.mrf.mxu3  ;;  %v1677_v7 = vpop.f32.mrf.mxu1  ;;  %v1589_v11 = vadd.f32 %v1588_v57, %v3616_v52  ;;  %v2976_v52 = vld [vmem:[%s4374_s1 + $0x3d4] sm:$0xf]  ;;  %v1904_v57 = vld [vmem:[#allocation2 + $0x8] sm:$0xff] }
 0x218   : > { %v2841_v0 = vor.u32 %v2976_v52, %v2838_v16 }
 0x219   : > { %v1854_v8 = vadd.f32 %v1853_v5, %v1765_v4  ;;  %v1678_v26 = vadd.f32 %v1677_v7, %v1589_v11 }
 0x21b   : > { %v1972_v14 = vsel %vm1935_vm0, %v1854_v8, -inf  ;;  %v2132_v8 = vld [vmem:[%s4375_s2] sm:$0xff] }
 0x21c   : > { %1973 = vmax.xlane.f32.xlu0 %v1972_v14 }
 0x21e   : > { %v1766_v28 = vpop.f32.mrf.mxu2  ;;  %v1591_v34 = vpop.f32.mrf.mxu0 }
 0x21f   : > { %v1767_v49 = vadd.f32 %v1766_v28, %v1678_v26  ;;  %v1855_v33 = vpop.f32.mrf.mxu3  ;;  %v1680_v36 = vpop.f32.mrf.mxu1  ;;  %v1592_v41 = vadd.f32 %v1591_v34, %v3618_v62 }
 0x221   : > { %v1856_v38 = vadd.f32 %v1855_v33, %v1767_v49  ;;  %1630 = vmatmul.bf16.gmra.mxu0 %v2837_v29  ;;  %v1681_v62 = vadd.f32 %v1680_v36, %v1592_v41  ;;  %v1905_v29 = vld [vmem:[#allocation2 + $0x10] sm:$0xff] }
 0x222   : > { %1719 = vmatmul.bf16.gmra.mxu1 %v2841_v0 }
 0x223   : > { %1808 = vmatmul.bf16.gmra.mxu2 %v2845_v35  ;;  %v1975_v9 = vsel %vm1935_vm0, %v1856_v38, -inf }
 0x224   : > { %1897 = vmatmul.bf16.gmra.mxu3 %v2849_v21  ;;  %1976 = vmax.xlane.f32.xlu1 %v1975_v9 }
 0x226   : > { %v1769_v42 = vpop.f32.mrf.mxu2  ;;  %v1593_v44 = vpop.f32.mrf.mxu0 }
 0x227   : > { %v1770_v25 = vadd.f32 %v1769_v42, %v1681_v62  ;;  %v1858_v43 = vpop.f32.mrf.mxu3  ;;  %v1682_v45 = vpop.f32.mrf.mxu1  ;;  %v1594_v31 = vadd.f32 %v1593_v44, %v3644_v20  ;;  %v1906_v44 = vld [vmem:[#allocation2 + $0x18] sm:$0xff] }
 0x229   : > { %v1859_v47 = vadd.f32 %v1858_v43, %v1770_v25  ;;  %v1683_v51 = vadd.f32 %v1682_v45, %v1594_v31 }
 0x22b   : > { %v1978_v48 = vsel %vm1935_vm0, %v1859_v47, -inf  ;;  %v2134_v47 = vld [vmem:[%s4375_s2 + $0x10] sm:$0xff] }
 0x22c   : > { %1979 = vmax.xlane.f32.xlu2 %v1978_v48 }
 0x22e   : > { %v1771_v58 = vpop.f32.mrf.mxu2  ;;  %v1596_v30 = vpop.f32.mrf.mxu0 }
 0x22f   : > { %v1772_v56 = vadd.f32 %v1771_v58, %v1683_v51  ;;  %v1860_v60 = vpop.f32.mrf.mxu3  ;;  %v1938_v61 = vpop.xlane.xlu0 %1937  ;;  %v1597_v5 = vadd.f32 %v1596_v30, %v3646_v32 }
 0x230   : > { %v2032_v63 = vmax.f32 %v1903_v53, %v1938_v61  ;;  %v1685_v3 = vpop.f32.mrf.mxu1 }
 0x231   : > { %v1861_v4 = vadd.f32 %v1860_v60, %v1772_v56  ;;  %v1686_v54 = vadd.f32 %v1685_v3, %v1597_v5  ;;  %v1907_v5 = vld [vmem:[#allocation2 + $0x20] sm:$0xff] }
 0x232   : > { %2065 = vst.msk [vmem:[#allocation2] sm:$0xff] %vm198_vm1, %v2032_v63 }
 0x233   : > { %v1981_v20 = vsel %vm1935_vm0, %v1861_v4, -inf }
 0x234   : > { %1982 = vmax.xlane.f32.xlu0 %v1981_v20 }
 0x236   : > { %v1774_v7 = vpop.f32.mrf.mxu2  ;;  %v1598_v52 = vpop.f32.mrf.mxu0 }
 0x237   : > { %v1775_v11 = vadd.f32 %v1774_v7, %v1686_v54  ;;  %v1863_v12 = vpop.f32.mrf.mxu3  ;;  %v1941_v13 = vpop.xlane.xlu0 %1940  ;;  %v1599_v18 = vadd.f32 %v1598_v52, %v3672_v55  ;;  %v2133_v55 = vld [vmem:[%s4375_s2 + $0x8] sm:$0xff]  ;;  %v2135_v54 = vld [vmem:[%s4375_s2 + $0x18] sm:$0xff] }
 0x238   : > { %v2033_v14 = vmax.f32 %v1904_v57, %v1941_v13  ;;  %v1687_v16 = vpop.f32.mrf.mxu1 }
 0x239   : > { %v2100_v32 = vld [vmem:[#allocation2] sm:$0xff]  ;;  %v1864_v17 = vadd.f32 %v1863_v12, %v1775_v11  ;;  %v1688_v28 = vadd.f32 %v1687_v16, %v1599_v18 }
 0x23a   : > { %v2164_v26 = vadd.f32 %v2132_v8, %v2100_v32  ;;  %2066 = vst.msk [vmem:[#allocation2 + $0x8] sm:$0xff] %vm198_vm1, %v2033_v14 }
 0x23b   : > { %v1984_v19 = vsel %vm1935_vm0, %v1864_v17, -inf }
 0x23c   : > { %v2196_v23 = vmax.f32 %v2164_v26, 0.0  ;;  %1985 = vmax.xlane.f32.xlu1 %v1984_v19  ;;  %v1908_v26 = vld [vmem:[#allocation2 + $0x28] sm:$0xff] }
 0x23e   : > { %2228 = vst.msk [vmem:[%s4145_s19] sm:$0xff] %vm198_vm1, %v2196_v23  ;;  %v1776_v49 = vpop.f32.mrf.mxu2  ;;  %v1601_v36 = vpop.f32.mrf.mxu0  ;;  %v2136_v23 = vld [vmem:[%s4375_s2 + $0x20] sm:$0xff] }
 0x23f   : > { %v1777_v33 = vadd.f32 %v1776_v49, %v1688_v28  ;;  %v1865_v34 = vpop.f32.mrf.mxu3  ;;  %v1944_v0 = vpop.xlane.xlu1 %1943  ;;  %v1602_v9 = vadd.f32 %v1601_v36, %v3674_v2 }
 0x240   : > { %v2034_v35 = vmax.f32 %v1905_v29, %v1944_v0  ;;  %v1690_v21 = vpop.f32.mrf.mxu1 }
 0x241   : > { %v2101_v38 = vld [vmem:[#allocation2 + $0x8] sm:$0xff]  ;;  %v1866_v41 = vadd.f32 %v1865_v34, %v1777_v33  ;;  %v1691_v43 = vadd.f32 %v1690_v21, %v1602_v9  ;;  %v1909_v9 = vld [vmem:[#allocation2 + $0x30] sm:$0xff] }
 0x242   : > { %v2165_v62 = vadd.f32 %v2133_v55, %v2101_v38  ;;  %2067 = vst.msk [vmem:[#allocation2 + $0x10] sm:$0xff] %vm198_vm1, %v2034_v35 }
 0x243   : > { %v1987_v42 = vsel %vm1935_vm0, %v1866_v41, -inf }
 0x244   : > { %v2197_v25 = vmax.f32 %v2165_v62, 0.0  ;;  %1988 = vmax.xlane.f32.xlu2 %v1987_v42  ;;  %v2137_v42 = vld [vmem:[%s4375_s2 + $0x28] sm:$0xff] }
 0x246   : > { %2229 = vst.msk [vmem:[%s4145_s19 + $0x8] sm:$0xff] %vm198_vm1, %v2197_v25  ;;  %v1779_v45 = vpop.f32.mrf.mxu2  ;;  %v1603_v53 = vpop.f32.mrf.mxu0 }
 0x247   : > { %v1780_v31 = vadd.f32 %v1779_v45, %v1691_v43  ;;  %v1868_v48 = vpop.f32.mrf.mxu3  ;;  %v1947_v2 = vpop.xlane.xlu1 %1946  ;;  %v1604_v61 = vadd.f32 %v1603_v53, %v3700_v27 }
 0x248   : > { %v2035_v51 = vmax.f32 %v1906_v44, %v1947_v2  ;;  %v1692_v58 = vpop.f32.mrf.mxu1 }
 0x249   : > { %v2102_v56 = vld [vmem:[#allocation2 + $0x10] sm:$0xff]  ;;  %v1869_v60 = vadd.f32 %v1868_v48, %v1780_v31  ;;  %v1693_v4 = vadd.f32 %v1692_v58, %v1604_v61 }
 0x24a   : > { %v2166_v63 = vadd.f32 %v2134_v47, %v2102_v56  ;;  %2068 = vst.msk [vmem:[#allocation2 + $0x18] sm:$0xff] %vm198_vm1, %v2035_v51 }
 0x24b   : > { %v1990_v30 = vsel %vm1935_vm0, %v1869_v60, -inf  ;;  %v1910_v60 = vld [vmem:[#allocation2 + $0x38] sm:$0xff] }
 0x24c   : > { %v2198_v3 = vmax.f32 %v2166_v63, 0.0  ;;  %1991 = vmax.xlane.f32.xlu0 %v1990_v30  ;;  %v2138_v63 = vld [vmem:[%s4375_s2 + $0x30] sm:$0xff] }
 0x24e   : > { %2230 = vst.msk [vmem:[%s4145_s19 + $0x10] sm:$0xff] %vm198_vm1, %v2198_v3  ;;  %v1781_v20 = vpop.f32.mrf.mxu2  ;;  %v1606_v11 = vpop.f32.mrf.mxu0 }
 0x24f   : > { %v1782_v57 = vadd.f32 %v1781_v20, %v1693_v4  ;;  %v1870_v7 = vpop.f32.mrf.mxu3  ;;  %v1950_v27 = vpop.xlane.xlu2 %1949  ;;  %v1607_v52 = vadd.f32 %v1606_v11, %v3702_v37 }
 0x250   : > { %v2036_v8 = vmax.f32 %v1907_v5, %v1950_v27  ;;  %v1695_v12 = vpop.f32.mrf.mxu1 }
 0x251   : > { %v2103_v13 = vld [vmem:[#allocation2 + $0x18] sm:$0xff]  ;;  %v1871_v14 = vadd.f32 %v1870_v7, %v1782_v57  ;;  %v1696_v18 = vadd.f32 %v1695_v12, %v1607_v52 }
 0x252   : > { %v2167_v16 = vadd.f32 %v2135_v54, %v2103_v13  ;;  %2069 = vst.msk [vmem:[#allocation2 + $0x20] sm:$0xff] %vm198_vm1, %v2036_v8  ;;  %v1911_v13 = vld [vmem:[#allocation2 + $0x40] sm:$0xff]  ;;  %v2139_v52 = vld [vmem:[%s4375_s2 + $0x38] sm:$0xff] }
 0x253   : > { %v1993_v32 = vsel %vm1935_vm0, %v1871_v14, -inf }
 0x254   : > { %v2199_v17 = vmax.f32 %v2167_v16, 0.0  ;;  %1994 = vmax.xlane.f32.xlu1 %v1993_v32 }
 0x256   : > { %2231 = vst.msk [vmem:[%s4145_s19 + $0x18] sm:$0xff] %vm198_vm1, %v2199_v17  ;;  %v1784_v19 = vpop.f32.mrf.mxu2  ;;  %v1608_v55 = vpop.f32.mrf.mxu0 }
 0x257   : > { %v1785_v28 = vadd.f32 %v1784_v19, %v1696_v18  ;;  %v1873_v29 = vpop.f32.mrf.mxu3  ;;  %v1953_v37 = vpop.xlane.xlu2 %1952  ;;  %v1609_v35 = vadd.f32 %v1608_v55, %v3728_v1 }
 0x258   : > { %v2037_v49 = vmax.f32 %v1908_v26, %v1953_v37  ;;  %v1697_v33 = vpop.f32.mrf.mxu1 }
 0x259   : > { %v2104_v34 = vld [vmem:[#allocation2 + $0x20] sm:$0xff]  ;;  %v1874_v0 = vadd.f32 %v1873_v29, %v1785_v28  ;;  %v1698_v41 = vadd.f32 %v1697_v33, %v1609_v35  ;;  %v1912_v33 = vld [vmem:[#allocation2 + $0x48] sm:$0xff] }
 0x25a   : > { %v2168_v36 = vadd.f32 %v2136_v23, %v2104_v34  ;;  %2070 = vst.msk [vmem:[#allocation2 + $0x28] sm:$0xff] %vm198_vm1, %v2037_v49 }
 0x25b   : > { %v1996_v21 = vsel %vm1935_vm0, %v1874_v0, -inf  ;;  %v2140_v0 = vld [vmem:[%s4375_s2 + $0x40] sm:$0xff] }
 0x25c   : > { %v2200_v38 = vmax.f32 %v2168_v36, 0.0  ;;  %1997 = vmax.xlane.f32.xlu2 %v1996_v21 }
 0x25e   : > { %2232 = vst.msk [vmem:[%s4145_s19 + $0x20] sm:$0xff] %vm198_vm1, %v2200_v38  ;;  %v1786_v62 = vpop.f32.mrf.mxu2  ;;  %v1611_v45 = vpop.f32.mrf.mxu0 }
 0x25f   : > { %v1787_v25 = vadd.f32 %v1786_v62, %v1698_v41  ;;  %v1875_v43 = vpop.f32.mrf.mxu3  ;;  %v1956_v1 = vpop.xlane.xlu0 %1955  ;;  %v1612_v2 = vadd.f32 %v1611_v45, %v3730_v10  ;;  %v1913_v45 = vld [vmem:[#allocation2 + $0x50] sm:$0xff] }
 0x260   : > { %v2038_v44 = vmax.f32 %v1909_v9, %v1956_v1  ;;  %v1700_v47 = vpop.f32.mrf.mxu1 }
 0x261   : > { %v2105_v31 = vld [vmem:[#allocation2 + $0x28] sm:$0xff]  ;;  %v1876_v48 = vadd.f32 %v1875_v43, %v1787_v25  ;;  %v1701_v56 = vadd.f32 %v1700_v47, %v1612_v2 }
 0x262   : > { %v2169_v51 = vadd.f32 %v2137_v42, %v2105_v31  ;;  %2071 = vst.msk [vmem:[#allocation2 + $0x30] sm:$0xff] %vm198_vm1, %v2038_v44  ;;  %v2141_v31 = vld [vmem:[%s4375_s2 + $0x48] sm:$0xff] }
 0x263   : > { %v1999_v53 = vsel %vm1935_vm0, %v1876_v48, -inf }
 0x264   : > { %v2201_v58 = vmax.f32 %v2169_v51, 0.0  ;;  %2000 = vmax.xlane.f32.xlu0 %v1999_v53 }
 0x266   : > { %2233 = vst.msk [vmem:[%s4145_s19 + $0x28] sm:$0xff] %vm198_vm1, %v2201_v58  ;;  %v1789_v61 = vpop.f32.mrf.mxu2  ;;  %v1613_v5 = vpop.f32.mrf.mxu0 }
 0x267   : > { %v1790_v30 = vadd.f32 %v1789_v61, %v1701_v56  ;;  %v1878_v3 = vpop.f32.mrf.mxu3  ;;  %v1959_v10 = vpop.xlane.xlu1 %1958  ;;  %v1614_v7 = vadd.f32 %v1613_v5, %v3756_v39 }
 0x268   : > { %v2039_v4 = vmax.f32 %v1910_v60, %v1959_v10  ;;  %v1702_v20 = vpop.f32.mrf.mxu1 }
 0x269   : > { %v2106_v54 = vld [vmem:[#allocation2 + $0x30] sm:$0xff]  ;;  %v1879_v57 = vadd.f32 %v1878_v3, %v1790_v30  ;;  %v1703_v12 = vadd.f32 %v1702_v20, %v1614_v7 }
 0x26a   : > { %v2170_v27 = vadd.f32 %v2138_v63, %v2106_v54  ;;  %2072 = vst.msk [vmem:[#allocation2 + $0x38] sm:$0xff] %vm198_vm1, %v2039_v4  ;;  %v1914_v4 = vld [vmem:[#allocation2 + $0x58] sm:$0xff]  ;;  %v2142_v20 = vld [vmem:[%s4375_s2 + $0x50] sm:$0xff] }
 0x26b   : > { %v2002_v8 = vsel %vm1935_vm0, %v1879_v57, -inf }
 0x26c   : > { %v2202_v11 = vmax.f32 %v2170_v27, 0.0  ;;  %2003 = vmax.xlane.f32.xlu1 %v2002_v8 }
 0x26e   : > { %2234 = vst.msk [vmem:[%s4145_s19 + $0x30] sm:$0xff] %vm198_vm1, %v2202_v11  ;;  %v1791_v14 = vpop.f32.mrf.mxu2  ;;  %v1616_v18 = vpop.f32.mrf.mxu0 }
 0x26f   : > { %v1792_v16 = vadd.f32 %v1791_v14, %v1703_v12  ;;  %v1880_v32 = vpop.f32.mrf.mxu3  ;;  %v1962_v39 = vpop.xlane.xlu2 %1961  ;;  %v1617_v28 = vadd.f32 %v1616_v18, %v3758_v46  ;;  %v2143_v18 = vld [vmem:[%s4375_s2 + $0x58] sm:$0xff] }
 0x270   : > { %v2040_v17 = vmax.f32 %v1911_v13, %v1962_v39  ;;  %v1705_v26 = vpop.f32.mrf.mxu1  ;;  %v1915_v39 = vld [vmem:[#allocation2 + $0x60] sm:$0xff] }
 0x271   : > { %v2107_v19 = vld [vmem:[#allocation2 + $0x38] sm:$0xff]  ;;  %v1881_v23 = vadd.f32 %v1880_v32, %v1792_v16  ;;  %v1706_v55 = vadd.f32 %v1705_v26, %v1617_v28 }
 0x272   : > { %v2171_v29 = vadd.f32 %v2139_v52, %v2107_v19  ;;  %2073 = vst.msk [vmem:[#allocation2 + $0x40] sm:$0xff] %vm198_vm1, %v2040_v17 }
 0x273   : > { %v2005_v37 = vsel %vm1935_vm0, %v1881_v23, -inf }
 0x274   : > { %v2203_v49 = vmax.f32 %v2171_v29, 0.0  ;;  %2006 = vmax.xlane.f32.xlu2 %v2005_v37 }
 0x276   : > { %2235 = vst.msk [vmem:[%s4145_s19 + $0x38] sm:$0xff] %vm198_vm1, %v2203_v49  ;;  %v1794_v34 = vpop.f32.mrf.mxu2  ;;  %v1618_v38 = vpop.f32.mrf.mxu0 }
 0x277   : > { %v1795_v35 = vadd.f32 %v1794_v34, %v1706_v55  ;;  %v1883_v36 = vpop.f32.mrf.mxu3  ;;  %v1965_v46 = vpop.xlane.xlu0 %1964  ;;  %v1619_v42 = vadd.f32 %v1618_v38, %v3784_v15 }
 0x278   : > { %v2041_v21 = vmax.f32 %v1912_v33, %v1965_v46  ;;  %v1707_v41 = vpop.f32.mrf.mxu1 }
 0x279   : > { %v2108_v9 = vld [vmem:[#allocation2 + $0x40] sm:$0xff]  ;;  %v1884_v62 = vadd.f32 %v1883_v36, %v1795_v35  ;;  %v1708_v44 = vadd.f32 %v1707_v41, %v1619_v42  ;;  %v1916_v36 = vld [vmem:[#allocation2 + $0x68] sm:$0xff] }
 0x27a   : > { %v2172_v25 = vadd.f32 %v2140_v0, %v2108_v9  ;;  %2074 = vst.msk [vmem:[#allocation2 + $0x48] sm:$0xff] %vm198_vm1, %v2041_v21  ;;  %v2144_v21 = vld [vmem:[%s4375_s2 + $0x60] sm:$0xff] }
 0x27b   : > { %v2008_v43 = vsel %vm1935_vm0, %v1884_v62, -inf }
 0x27c   : > { %v2204_v1 = vmax.f32 %v2172_v25, 0.0  ;;  %2009 = vmax.xlane.f32.xlu0 %v2008_v43 }
 0x27e   : > { %2236 = vst.msk [vmem:[%s4145_s19 + $0x40] sm:$0xff] %vm198_vm1, %v2204_v1  ;;  %v1796_v47 = vpop.f32.mrf.mxu2  ;;  %v1621_v53 = vpop.f32.mrf.mxu0 }
 0x27f   : > { %v1797_v48 = vadd.f32 %v1796_v47, %v1708_v44  ;;  %v1885_v2 = vpop.f32.mrf.mxu3  ;;  %v1968_v15 = vpop.xlane.xlu1 %1967  ;;  %v1622_v61 = vadd.f32 %v1621_v53, %v3786_v24 }
 0x280   : > { %v2042_v51 = vmax.f32 %v1913_v45, %v1968_v15  ;;  %v1710_v58 = vpop.f32.mrf.mxu1  ;;  %v2145_v15 = vld [vmem:[%s4375_s2 + $0x68] sm:$0xff] }
 0x281   : > { %v2109_v56 = vld [vmem:[#allocation2 + $0x48] sm:$0xff]  ;;  %v1886_v60 = vadd.f32 %v1885_v2, %v1797_v48  ;;  %v1711_v10 = vadd.f32 %v1710_v58, %v1622_v61  ;;  %v1917_v48 = vld [vmem:[#allocation2 + $0x70] sm:$0xff] }
 0x282   : > { %v2173_v63 = vadd.f32 %v2141_v31, %v2109_v56  ;;  %2075 = vst.msk [vmem:[#allocation2 + $0x50] sm:$0xff] %vm198_vm1, %v2042_v51 }
 0x283   : > { %v2011_v30 = vsel %vm1935_vm0, %v1886_v60, -inf }
 0x284   : > { %v2205_v3 = vmax.f32 %v2173_v63, 0.0  ;;  %2012 = vmax.xlane.f32.xlu1 %v2011_v30 }
 0x286   : > { %2237 = vst.msk [vmem:[%s4145_s19 + $0x48] sm:$0xff] %vm198_vm1, %v2205_v3  ;;  %v1799_v5 = vpop.f32.mrf.mxu2  ;;  %v1623_v27 = vpop.f32.mrf.mxu0 }
 0x287   : > { %v1800_v54 = vadd.f32 %v1799_v5, %v1711_v10  ;;  %v1888_v57 = vpop.f32.mrf.mxu3  ;;  %v1971_v24 = vpop.xlane.xlu2 %1970  ;;  %v1624_v13 = vadd.f32 %v1623_v27, %v3812_v59 }
 0x288   : > { %v2043_v7 = vmax.f32 %v1914_v4, %v1971_v24  ;;  %v1712_v8 = vpop.f32.mrf.mxu1 }
 0x289   : > { %v2110_v11 = vld [vmem:[#allocation2 + $0x50] sm:$0xff]  ;;  %v1889_v12 = vadd.f32 %v1888_v57, %v1800_v54  ;;  %v1713_v32 = vadd.f32 %v1712_v8, %v1624_v13 }
 0x28a   : > { %v2174_v14 = vadd.f32 %v2142_v20, %v2110_v11  ;;  %2076 = vst.msk [vmem:[#allocation2 + $0x58] sm:$0xff] %vm198_vm1, %v2043_v7  ;;  %v1918_v20 = vld [vmem:[#allocation2 + $0x78] sm:$0xff]  ;;  %v2146_v57 = vld [vmem:[%s4375_s2 + $0x70] sm:$0xff] }
 0x28b   : > { %v2014_v52 = vsel %vm1935_vm0, %v1889_v12, -inf }
 0x28c   : > { %v2206_v16 = vmax.f32 %v2174_v14, 0.0  ;;  %2015 = vmax.xlane.f32.xlu2 %v2014_v52 }
 0x28e   : > { %2238 = vst.msk [vmem:[%s4145_s19 + $0x50] sm:$0xff] %vm198_vm1, %v2206_v16  ;;  %v1801_v17 = vpop.f32.mrf.mxu2  ;;  %v1626_v28 = vpop.f32.mrf.mxu0 }
 0x28f   : > { %v1802_v26 = vadd.f32 %v1801_v17, %v1713_v32  ;;  %v1890_v19 = vpop.f32.mrf.mxu3  ;;  %v1974_v59 = vpop.xlane.xlu0 %1973  ;;  %v1627_v55 = vadd.f32 %v1626_v28, %v3814_v6  ;;  %v1919_v17 = vld [vmem:[#allocation2 + $0x80] sm:$0xff] }
 0x290   : > { %v2044_v23 = vmax.f32 %v1915_v39, %v1974_v59  ;;  %v1715_v29 = vpop.f32.mrf.mxu1 }
 0x291   : > { %v2111_v37 = vld [vmem:[#allocation2 + $0x58] sm:$0xff]  ;;  %v1891_v49 = vadd.f32 %v1890_v19, %v1802_v26  ;;  %v1716_v35 = vadd.f32 %v1715_v29, %v1627_v55 }
 0x292   : > { %v2175_v33 = vadd.f32 %v2143_v18, %v2111_v37  ;;  %2077 = vst.msk [vmem:[#allocation2 + $0x60] sm:$0xff] %vm198_vm1, %v2044_v23  ;;  %v2147_v26 = vld [vmem:[%s4375_s2 + $0x78] sm:$0xff] }
 0x293   : > { %v2017_v34 = vsel %vm1935_vm0, %v1891_v49, -inf }
 0x294   : > { %v2207_v0 = vmax.f32 %v2175_v33, 0.0  ;;  %2018 = vmax.xlane.f32.xlu0 %v2017_v34  ;;  %v1920_v33 = vld [vmem:[#allocation2 + $0x88] sm:$0xff]  ;;  %v2148_v34 = vld [vmem:[%s4375_s2 + $0x80] sm:$0xff] }
 0x296   : > { %2239 = vst.msk [vmem:[%s4145_s19 + $0x58] sm:$0xff] %vm198_vm1, %v2207_v0  ;;  %v1804_v46 = vpop.f32.mrf.mxu2  ;;  %v1628_v62 = vpop.f32.mrf.mxu0 }
 0x297   : > { %v1805_v38 = vadd.f32 %v1804_v46, %v1716_v35  ;;  %v1893_v41 = vpop.f32.mrf.mxu3  ;;  %v1977_v6 = vpop.xlane.xlu1 %1976  ;;  %v1629_v1 = vadd.f32 %v1628_v62, %v3840_v40 }
 0x298   : > { %v2045_v9 = vmax.f32 %v1916_v36, %v1977_v6  ;;  %v1717_v42 = vpop.f32.mrf.mxu1 }
 0x299   : > { %v2112_v25 = vld [vmem:[#allocation2 + $0x60] sm:$0xff]  ;;  %v1894_v43 = vadd.f32 %v1893_v41, %v1805_v38  ;;  %v1718_v31 = vadd.f32 %v1717_v42, %v1629_v1  ;;  %v1921_v38 = vld [vmem:[#allocation2 + $0x90] sm:$0xff]  ;;  %v2149_v41 = vld [vmem:[%s4375_s2 + $0x88] sm:$0xff] }
 0x29a   : > { %v2176_v44 = vadd.f32 %v2144_v21, %v2112_v25  ;;  %2078 = vst.msk [vmem:[#allocation2 + $0x68] sm:$0xff] %vm198_vm1, %v2045_v9  ;;  %v2150_v1 = vld [vmem:[%s4375_s2 + $0x90] sm:$0xff] }
 0x29b   : > { %v2020_v45 = vsel %vm1935_vm0, %v1894_v43, -inf  ;;  %v1922_v43 = vld [vmem:[#allocation2 + $0x98] sm:$0xff] }
 0x29c   : > { %v2208_v47 = vmax.f32 %v2176_v44, 0.0  ;;  %2021 = vmax.xlane.f32.xlu1 %v2020_v45 }
 0x29e   : > { %2240 = vst.msk [vmem:[%s4145_s19 + $0x60] sm:$0xff] %vm198_vm1, %v2208_v47  ;;  %v1806_v2 = vpop.f32.mrf.mxu2  ;;  %v1631_v56 = vpop.f32.mrf.mxu0 }
 0x29f   : > { %v1807_v51 = vadd.f32 %v1806_v2, %v1718_v31  ;;  %v1895_v53 = vpop.f32.mrf.mxu3  ;;  %v1980_v40 = vpop.xlane.xlu2 %1979  ;;  %v1632_v63 = vadd.f32 %v1631_v56, %v3842_v50  ;;  %v1923_v2 = vld [vmem:[#allocation2 + $0xa0] sm:$0xff] }
 0x2a0   : > { %v2046_v58 = vmax.f32 %v1917_v48, %v1980_v40  ;;  %v1720_v3 = vpop.f32.mrf.mxu1 }
 0x2a1   : > { %v2113_v60 = vld [vmem:[#allocation2 + $0x68] sm:$0xff]  ;;  %v1896_v61 = vadd.f32 %v1895_v53, %v1807_v51  ;;  %v1721_v5 = vadd.f32 %v1720_v3, %v1632_v63 }
 0x2a2   : > { %v2177_v30 = vadd.f32 %v2145_v15, %v2113_v60  ;;  %2079 = vst.msk [vmem:[#allocation2 + $0x70] sm:$0xff] %vm198_vm1, %v2046_v58  ;;  %v2151_v15 = vld [vmem:[%s4375_s2 + $0x98] sm:$0xff]  ;;  %v1924_v60 = vld [vmem:[#allocation2 + $0xa8] sm:$0xff] }
 0x2a3   : > { %v2023_v10 = vsel %vm1935_vm0, %v1896_v61, -inf  ;;  %v2152_v61 = vld [vmem:[%s4375_s2 + $0xa0] sm:$0xff] }
 0x2a4   : > { %v2209_v4 = vmax.f32 %v2177_v30, 0.0  ;;  %2024 = vmax.xlane.f32.xlu2 %v2023_v10 }
 0x2a6   : > { %2241 = vst.msk [vmem:[%s4145_s19 + $0x68] sm:$0xff] %vm198_vm1, %v2209_v4  ;;  %v1809_v54 = vpop.f32.mrf.mxu2  ;;  %v1633_v8 = vpop.f32.mrf.mxu0 }
 0x2a7   : > { %v1810_v24 = vadd.f32 %v1809_v54, %v1721_v5  ;;  %v1898_v50 = vpop.f32.mrf.mxu3  ;;  %v1983_v7 = vpop.xlane.xlu0 %1982  ;;  %v1634_v13 = vadd.f32 %v1633_v8, %v3868_v22  ;;  %v1925_v5 = vld [vmem:[#allocation2 + $0xb0] sm:$0xff] }
 0x2a8   : > { %v2047_v27 = vmax.f32 %v1918_v20, %v1983_v7  ;;  %v1722_v32 = vpop.f32.mrf.mxu1  ;;  %v2153_v20 = vld [vmem:[%s4375_s2 + $0xa8] sm:$0xff]  ;;  %v2154_v8 = vld [vmem:[%s4375_s2 + $0xb0] sm:$0xff] }
 0x2a9   : > { %v2114_v11 = vld [vmem:[#allocation2 + $0x70] sm:$0xff]  ;;  %v1899_v12 = vadd.f32 %v1898_v50, %v1810_v24  ;;  %v1723_v39 = vadd.f32 %v1722_v32, %v1634_v13  ;;  %v2155_v32 = vld [vmem:[%s4375_s2 + $0xb8] sm:$0xff] }
 0x2aa   : > { %v2178_v14 = vadd.f32 %v2146_v57, %v2114_v11  ;;  %2080 = vst.msk [vmem:[#allocation2 + $0x78] sm:$0xff] %vm198_vm1, %v2047_v27  ;;  %v1926_v27 = vld [vmem:[#allocation2 + $0xb8] sm:$0xff] }
 0x2ab   : > { %v2026_v52 = vsel %vm1935_vm0, %v1899_v12, -inf }
 0x2ac   : > { %v2210_v16 = vmax.f32 %v2178_v14, 0.0  ;;  %2027 = vmax.xlane.f32.xlu0 %v2026_v52 }
 0x2ae   : > { %2242 = vst.msk [vmem:[%s4145_s19 + $0x70] sm:$0xff] %vm198_vm1, %v2210_v16  ;;  %v1811_v18 = vpop.f32.mrf.mxu2  ;;  %v1927_v16 = vld [vmem:[#allocation2 + $0xc0] sm:$0xff] }
 0x2af   : > { %v1812_v19 = vadd.f32 %v1811_v18, %v1723_v39  ;;  %v1986_v22 = vpop.xlane.xlu1 %1985  ;;  %v1900_v59 = vpop.f32.mrf.mxu3 }
 0x2b0   : > { %v2048_v23 = vmax.f32 %v1919_v17, %v1986_v22  ;;  %v1928_v22 = vld [vmem:[#allocation2 + $0xc8] sm:$0xff] }
 0x2b1   : > { %v2115_v28 = vld [vmem:[#allocation2 + $0x78] sm:$0xff]  ;;  %v1901_v29 = vadd.f32 %v1900_v59, %v1812_v19  ;;  %v2156_v59 = vld [vmem:[%s4375_s2 + $0xc0] sm:$0xff] }
 0x2b2   : > { %v2179_v37 = vadd.f32 %v2147_v26, %v2115_v28  ;;  %2081 = vst.msk [vmem:[#allocation2 + $0x80] sm:$0xff] %vm198_vm1, %v2048_v23 }
 0x2b3   : > { %v2029_v49 = vsel %vm1935_vm0, %v1901_v29, -inf }
 0x2b4   : > { %v2211_v55 = vmax.f32 %v2179_v37, 0.0  ;;  %2030 = vmax.xlane.f32.xlu1 %v2029_v49 }
 0x2b6   : > { %2243 = vst.msk [vmem:[%s4145_s19 + $0x78] sm:$0xff] %vm198_vm1, %v2211_v55  ;;  %v1929_v55 = vld [vmem:[#allocation2 + $0xd0] sm:$0xff] }
 0x2b7   : > { %v1989_v0 = vpop.xlane.xlu2 %1988 }
 0x2b8   : > { %v2049_v35 = vmax.f32 %v1920_v33, %v1989_v0  ;;  %v2157_v33 = vld [vmem:[%s4375_s2 + $0xc8] sm:$0xff] }
 0x2b9   : > { %v2116_v36 = vld [vmem:[#allocation2 + $0x80] sm:$0xff] }
 0x2ba   : > { %v2180_v46 = vadd.f32 %v2148_v34, %v2116_v36  ;;  %2082 = vst.msk [vmem:[#allocation2 + $0x88] sm:$0xff] %vm198_vm1, %v2049_v35 }
 0x2bc   : > { %v2212_v21 = vmax.f32 %v2180_v46, 0.0 }
 0x2be   : > { %2244 = vst.msk [vmem:[%s4145_s19 + $0x80] sm:$0xff] %vm198_vm1, %v2212_v21  ;;  %v1930_v21 = vld [vmem:[#allocation2 + $0xd8] sm:$0xff] }
 0x2bf   : > { %v1992_v6 = vpop.xlane.xlu0 %1991 }
 0x2c0   : > { %v2050_v9 = vmax.f32 %v1921_v38, %v1992_v6  ;;  %v2158_v38 = vld [vmem:[%s4375_s2 + $0xd0] sm:$0xff] }
 0x2c1   : > { %v2117_v62 = vld [vmem:[#allocation2 + $0x88] sm:$0xff] }
 0x2c2   : > { %v2181_v42 = vadd.f32 %v2149_v41, %v2117_v62  ;;  %2083 = vst.msk [vmem:[#allocation2 + $0x90] sm:$0xff] %vm198_vm1, %v2050_v9 }
 0x2c4   : > { %v2213_v25 = vmax.f32 %v2181_v42, 0.0 }
 0x2c6   : > { %2245 = vst.msk [vmem:[%s4145_s19 + $0x88] sm:$0xff] %vm198_vm1, %v2213_v25  ;;  %v1931_v25 = vld [vmem:[#allocation2 + $0xe0] sm:$0xff] }
 0x2c7   : > { %v1995_v44 = vpop.xlane.xlu1 %1994 }
 0x2c8   : > { %v2051_v45 = vmax.f32 %v1922_v43, %v1995_v44  ;;  %v2159_v43 = vld [vmem:[%s4375_s2 + $0xd8] sm:$0xff] }
 0x2c9   : > { %v2118_v47 = vld [vmem:[#allocation2 + $0x90] sm:$0xff] }
 0x2ca   : > { %v2182_v31 = vadd.f32 %v2150_v1, %v2118_v47  ;;  %2084 = vst.msk [vmem:[#allocation2 + $0x98] sm:$0xff] %vm198_vm1, %v2051_v45 }
 0x2cc   : > { %v2214_v48 = vmax.f32 %v2182_v31, 0.0 }
 0x2ce   : > { %2246 = vst.msk [vmem:[%s4145_s19 + $0x90] sm:$0xff] %vm198_vm1, %v2214_v48  ;;  %v1932_v48 = vld [vmem:[#allocation2 + $0xe8] sm:$0xff] }
 0x2cf   : > { %v1998_v51 = vpop.xlane.xlu2 %1997 }
 0x2d0   : > { %v2052_v53 = vmax.f32 %v1923_v2, %v1998_v51  ;;  %v2160_v2 = vld [vmem:[%s4375_s2 + $0xe0] sm:$0xff] }
 0x2d1   : > { %v2119_v40 = vld [vmem:[#allocation2 + $0x98] sm:$0xff] }
 0x2d2   : > { %v2183_v58 = vadd.f32 %v2151_v15, %v2119_v40  ;;  %2085 = vst.msk [vmem:[#allocation2 + $0xa0] sm:$0xff] %vm198_vm1, %v2052_v53 }
 0x2d4   : > { %v2215_v56 = vmax.f32 %v2183_v58, 0.0 }
 0x2d6   : > { %2247 = vst.msk [vmem:[%s4145_s19 + $0x98] sm:$0xff] %vm198_vm1, %v2215_v56  ;;  %v1933_v56 = vld [vmem:[#allocation2 + $0xf0] sm:$0xff] }
 0x2d7   : > { %v2001_v63 = vpop.xlane.xlu0 %2000 }
 0x2d8   : > { %v2053_v30 = vmax.f32 %v1924_v60, %v2001_v63  ;;  %v2161_v60 = vld [vmem:[%s4375_s2 + $0xe8] sm:$0xff] }
 0x2d9   : > { %v2120_v3 = vld [vmem:[#allocation2 + $0xa0] sm:$0xff] }
 0x2da   : > { %v2184_v10 = vadd.f32 %v2152_v61, %v2120_v3  ;;  %2086 = vst.msk [vmem:[#allocation2 + $0xa8] sm:$0xff] %vm198_vm1, %v2053_v30 }
 0x2dc   : > { %v2216_v4 = vmax.f32 %v2184_v10, 0.0 }
 0x2de   : > { %2248 = vst.msk [vmem:[%s4145_s19 + $0xa0] sm:$0xff] %vm198_vm1, %v2216_v4  ;;  %v1934_v4 = vld [vmem:[#allocation2 + $0xf8] sm:$0xff] }
 0x2df   : > { %v2004_v54 = vpop.xlane.xlu1 %2003 }
 0x2e0   : > { %v2054_v57 = vmax.f32 %v1925_v5, %v2004_v54  ;;  %v2162_v5 = vld [vmem:[%s4375_s2 + $0xf0] sm:$0xff] }
 0x2e1   : > { %v2121_v24 = vld [vmem:[#allocation2 + $0xa8] sm:$0xff] }
 0x2e2   : > { %v2185_v50 = vadd.f32 %v2153_v20, %v2121_v24  ;;  %2087 = vst.msk [vmem:[#allocation2 + $0xb0] sm:$0xff] %vm198_vm1, %v2054_v57 }
 0x2e4   : > { %v2217_v7 = vmax.f32 %v2185_v50, 0.0 }
 0x2e6   : > { %2249 = vst.msk [vmem:[%s4145_s19 + $0xa8] sm:$0xff] %vm198_vm1, %v2217_v7  ;;  %v2163_v7 = vld [vmem:[%s4375_s2 + $0xf8] sm:$0xff] }
 0x2e7   : > { %v2007_v11 = vpop.xlane.xlu2 %2006 }
 0x2e8   : > { %v2055_v12 = vmax.f32 %v1926_v27, %v2007_v11 }
 0x2e9   : > { %v2122_v13 = vld [vmem:[#allocation2 + $0xb0] sm:$0xff] }
 0x2ea   : > { %v2186_v14 = vadd.f32 %v2154_v8, %v2122_v13  ;;  %2088 = vst.msk [vmem:[#allocation2 + $0xb8] sm:$0xff] %vm198_vm1, %v2055_v12 }
 0x2ec   : > { %v2218_v52 = vmax.f32 %v2186_v14, 0.0 }
 0x2ee   : > { %2250 = vst.msk [vmem:[%s4145_s19 + $0xb0] sm:$0xff] %vm198_vm1, %v2218_v52 }
 0x2ef   : > { %v2010_v39 = vpop.xlane.xlu0 %2009 }
 0x2f0   : > { %v2056_v17 = vmax.f32 %v1927_v16, %v2010_v39 }
 0x2f1   : > { %v2123_v18 = vld [vmem:[#allocation2 + $0xb8] sm:$0xff] }
 0x2f2   : > { %v2187_v26 = vadd.f32 %v2155_v32, %v2123_v18  ;;  %2089 = vst.msk [vmem:[#allocation2 + $0xc0] sm:$0xff] %vm198_vm1, %v2056_v17 }
 0x2f4   : > { %v2219_v19 = vmax.f32 %v2187_v26, 0.0 }
 0x2f6   : > { %2251 = vst.msk [vmem:[%s4145_s19 + $0xb8] sm:$0xff] %vm198_vm1, %v2219_v19 }
 0x2f7   : > { %v2013_v23 = vpop.xlane.xlu1 %2012 }
 0x2f8   : > { %v2057_v28 = vmax.f32 %v1928_v22, %v2013_v23 }
 0x2f9   : > { %v2124_v29 = vld [vmem:[#allocation2 + $0xc0] sm:$0xff] }
 0x2fa   : > { %v2188_v37 = vadd.f32 %v2156_v59, %v2124_v29  ;;  %2090 = vst.msk [vmem:[#allocation2 + $0xc8] sm:$0xff] %vm198_vm1, %v2057_v28 }
 0x2fc   : > { %v2220_v49 = vmax.f32 %v2188_v37, 0.0 }
 0x2fe   : > { %2252 = vst.msk [vmem:[%s4145_s19 + $0xc0] sm:$0xff] %vm198_vm1, %v2220_v49 }
 0x2ff   : > { %v2016_v34 = vpop.xlane.xlu2 %2015 }
 0x300   : > { %v2058_v0 = vmax.f32 %v1929_v55, %v2016_v34 }
 0x301   : > { %v2125_v35 = vld [vmem:[#allocation2 + $0xc8] sm:$0xff] }
 0x302   : > { %v2189_v36 = vadd.f32 %v2157_v33, %v2125_v35  ;;  %2091 = vst.msk [vmem:[#allocation2 + $0xd0] sm:$0xff] %vm198_vm1, %v2058_v0 }
 0x304   : > { %v2221_v46 = vmax.f32 %v2189_v36, 0.0 }
 0x306   : > { %2253 = vst.msk [vmem:[%s4145_s19 + $0xc8] sm:$0xff] %vm198_vm1, %v2221_v46 }
 0x307   : > { %v2019_v41 = vpop.xlane.xlu0 %2018 }
 0x308   : > { %v2059_v6 = vmax.f32 %v1930_v21, %v2019_v41 }
 0x309   : > { %v2126_v9 = vld [vmem:[#allocation2 + $0xd0] sm:$0xff] }
 0x30a   : > { %v2190_v62 = vadd.f32 %v2158_v38, %v2126_v9  ;;  %2092 = vst.msk [vmem:[#allocation2 + $0xd8] sm:$0xff] %vm198_vm1, %v2059_v6 }
 0x30c   : > { %v2222_v42 = vmax.f32 %v2190_v62, 0.0 }
 0x30e   : > { %2254 = vst.msk [vmem:[%s4145_s19 + $0xd0] sm:$0xff] %vm198_vm1, %v2222_v42 }
 0x30f   : > { %v2022_v1 = vpop.xlane.xlu1 %2021 }
 0x310   : > { %v2060_v44 = vmax.f32 %v1931_v25, %v2022_v1 }
 0x311   : > { %v2127_v45 = vld [vmem:[#allocation2 + $0xd8] sm:$0xff] }
 0x312   : > { %v2191_v47 = vadd.f32 %v2159_v43, %v2127_v45  ;;  %2093 = vst.msk [vmem:[#allocation2 + $0xe0] sm:$0xff] %vm198_vm1, %v2060_v44 }
 0x314   : > { %v2223_v31 = vmax.f32 %v2191_v47, 0.0 }
 0x316   : > { %2255 = vst.msk [vmem:[%s4145_s19 + $0xd8] sm:$0xff] %vm198_vm1, %v2223_v31 }
 0x317   : > { %v2025_v15 = vpop.xlane.xlu2 %2024 }
 0x318   : > { %v2061_v51 = vmax.f32 %v1932_v48, %v2025_v15 }
 0x319   : > { %v2128_v53 = vld [vmem:[#allocation2 + $0xe0] sm:$0xff] }
 0x31a   : > { %v2192_v40 = vadd.f32 %v2160_v2, %v2128_v53  ;;  %2094 = vst.msk [vmem:[#allocation2 + $0xe8] sm:$0xff] %vm198_vm1, %v2061_v51 }
 0x31c   : > { %v2224_v58 = vmax.f32 %v2192_v40, 0.0 }
 0x31e   : > { %2256 = vst.msk [vmem:[%s4145_s19 + $0xe0] sm:$0xff] %vm198_vm1, %v2224_v58 }
 0x31f   : > { %v2028_v61 = vpop.xlane.xlu0 %2027 }
 0x320   : > { %v2062_v63 = vmax.f32 %v1933_v56, %v2028_v61 }
 0x321   : > { %v2129_v30 = vld [vmem:[#allocation2 + $0xe8] sm:$0xff] }
 0x322   : > { %v2193_v3 = vadd.f32 %v2161_v60, %v2129_v30  ;;  %2095 = vst.msk [vmem:[#allocation2 + $0xf0] sm:$0xff] %vm198_vm1, %v2062_v63 }
 0x324   : > { %v2225_v10 = vmax.f32 %v2193_v3, 0.0 }
 0x326   : > { %2257 = vst.msk [vmem:[%s4145_s19 + $0xe8] sm:$0xff] %vm198_vm1, %v2225_v10 }
 0x327   : > { %v2031_v20 = vpop.xlane.xlu1 %2030 }
 0x328   : > { %v2063_v54 = vmax.f32 %v1934_v4, %v2031_v20 }
 0x329   : > { %v2130_v57 = vld [vmem:[#allocation2 + $0xf0] sm:$0xff] }
 0x32a   : > { %v2194_v24 = vadd.f32 %v2162_v5, %v2130_v57  ;;  %2096 = vst.msk [vmem:[#allocation2 + $0xf8] sm:$0xff] %vm198_vm1, %v2063_v54 }
 0x32c   : > { %v2226_v50 = vmax.f32 %v2194_v24, 0.0 }
 0x32e   : > { %2258 = vst.msk [vmem:[%s4145_s19 + $0xf0] sm:$0xff] %vm198_vm1, %v2226_v50 }
 0x331   : > { %v2131_v27 = vld [vmem:[#allocation2 + $0xf8] sm:$0xff] }
 0x332   : > { %v2195_v8 = vadd.f32 %v2163_v7, %v2131_v27 }
 0x334   : > { %v2227_v11 = vmax.f32 %v2195_v8, 0.0 }
 0x336   : > { %2259 = vst.msk [vmem:[%s4145_s19 + $0xf8] sm:$0xff] %vm198_vm1, %v2227_v11 }
 0x337 PF: > { %s13_s14 = sadd.s32 1, %s3029_s14   ;;  %s4377_s12 = smov %s3025_s13 }
 0x338   : > { %p10_p5 = scmp.ge.s32.totalorder %s13_s14, 4   ;;  %s4378_s13 = smov %s4380_s15 }
 0x33a   :  { %12 = sbr.rel (!%p10_p5) target bundleno = 2 (0x2), region = 70 }

</bundles_post_ra>
